<compile_context>
chip_gen: v7x
topology: tpu7x:2x2x1
jax: 0.10.0
libtpu: 0.0.40
codegen_flags: <defaults>
</compile_context>

<pallas_src>
import jax
import jax.numpy as jnp
import numpy as np
from jax.experimental import pallas as pl
from jax.experimental.pallas import tpu as pltpu


def make_gru_kernel(hidden_size, chunk):
    H, TT = hidden_size, chunk

    def gru_kernel(x_ref, len_ref, wi_ref, wh_ref, bi_ref, bh_ref,
                   out_ref, h_scr):
        tc = pl.program_id(0)

        @pl.when(tc == 0)
        def _():
            # self.hidden = init_hidden() -> zeros
            h_scr[...] = jnp.zeros_like(h_scr)

        lens = len_ref[...]          # [B, 1] f32 sequence lengths
        wi = wi_ref[...]             # [H, 3H] bf16 fused input weights  (r|z|n)
        wh = wh_ref[...]             # [H, 3H] bf16 fused hidden weights (r|z|n)
        bi = bi_ref[...]             # [1, 3H] f32
        bh = bh_ref[...]             # [1, 3H] f32
        h = h_scr[...]               # [B, H] f32 carried hidden state

        # Statically-unrolled recurrence over the TT timesteps of this chunk.
        for tt in range(TT):
            t = tc * TT + tt
            # validity mask for this absolute timestep: 1 while t < length[b]
            m = (lens > t.astype(jnp.float32)).astype(jnp.float32)   # [B, 1]

            x_t = x_ref[tt]                                          # [B, H] bf16
            gx = jnp.dot(x_t, wi, preferred_element_type=jnp.float32) + bi
            gh = jnp.dot(h.astype(jnp.bfloat16), wh,
                         preferred_element_type=jnp.float32) + bh    # [B, 3H]

            # PyTorch GRU cell equations (gate order r, z, n)
            r = jax.nn.sigmoid(gx[:, :H] + gh[:, :H])
            z = jax.nn.sigmoid(gx[:, H:2 * H] + gh[:, H:2 * H])
            n = jnp.tanh(gx[:, 2 * H:] + r * gh[:, 2 * H:])
            h_new = n + z * (h - n)          # == (1 - z) * n + z * h

            # pack_padded_sequence semantics: finished sequences freeze hidden
            h = h + m * (h_new - h)
            # pad_packed_sequence zero-fills padded output positions
            out_ref[tt] = (m * h).astype(out_ref.dtype)

        h_scr[...] = h

    return gru_kernel


def encoder_forward(tokens, mask, params, *, max_len=None, chunk=32):
    """tokens: [B, T] int32, mask: [B, T] {0,1}.

    Returns [B, max_len, H] (or [B, T, H] if max_len is None).  `max_len` must
    be a static Python int (e.g. max(lengths) computed on the host), so this
    function is safe to jax.jit with max_len/chunk as static args.
    """
    emb = params["embedding"]                     # [V, H]
    B, T = tokens.shape
    H = emb.shape[1]

    TT = max(1, min(chunk, T))
    n_chunks = -(-T // TT)
    T_pad = n_chunks * TT

    # Embedding lookup, done directly in time-major order (only the tiny token
    # id matrix is transposed; no [B,T,H] activation transpose).
    tok_tm = jnp.transpose(tokens, (1, 0))                        # [T, B]
    if T_pad != T:
        tok_tm = jnp.pad(tok_tm, ((0, T_pad - T), (0, 0)))
    x_tm = jnp.take(emb, tok_tm, axis=0).astype(jnp.bfloat16)     # [T_pad, B, H]

    # lengths -> tiny [B, 1] f32 tensor; mask is rebuilt in-kernel.
    lengths = jnp.sum(mask, axis=1)
    lens_col = lengths.astype(jnp.float32)[:, None]               # [B, 1]

    # Fuse the six gate weight matrices / biases into two matmuls.
    w_i = jnp.concatenate(
        [params["w_ir"], params["w_iz"], params["w_in"]], axis=1).astype(jnp.bfloat16)
    w_h = jnp.concatenate(
        [params["w_hr"], params["w_hz"], params["w_hn"]], axis=1).astype(jnp.bfloat16)
    b_i = jnp.concatenate([params["b_ir"], params["b_iz"], params["b_in"]], axis=1)
    b_h = jnp.concatenate([params["b_hr"], params["b_hz"], params["b_hn"]], axis=1)

    step_spec = pl.BlockSpec((TT, B, H), lambda c: (c, 0, 0))
    const2 = lambda shape: pl.BlockSpec(shape, lambda c: (0, 0))

    out_tm = pl.pallas_call(
        make_gru_kernel(H, TT),
        out_shape=jax.ShapeDtypeStruct((T_pad, B, H), jnp.float32),
        grid=(n_chunks,),
        in_specs=[step_spec,                 # x (time-major chunks)
                  const2((B, 1)),            # lengths
                  const2((H, 3 * H)),        # W_i fused
                  const2((H, 3 * H)),        # W_h fused
                  const2((1, 3 * H)),        # b_i fused
                  const2((1, 3 * H))],       # b_h fused
        out_specs=step_spec,
        scratch_shapes=[pltpu.VMEM((B, H), jnp.float32)],   # carried hidden state
        compiler_params=pltpu.CompilerParams(dimension_semantics=("arbitrary",)),
    )(x_tm, lens_col, w_i, w_h, b_i, b_h)

    out = jnp.transpose(out_tm, (1, 0, 2))[:, :T, :]              # [B, T, H]
    if max_len is not None:
        out = out[:, :max_len, :]
    return out


def ref_forward(tokens, mask, params, *, max_len=None, matmul_dtype=jnp.bfloat16):
    """Pure-JAX reference of the same semantics (for self-check)."""
    emb = params["embedding"]
    x = jnp.take(emb, tokens, axis=0).astype(jnp.float32)         # [B, T, H]
    B, T, H = x.shape
    mf = mask.astype(jnp.float32)

    w_i = jnp.concatenate(
        [params["w_ir"], params["w_iz"], params["w_in"]], axis=1).astype(matmul_dtype)
    w_h = jnp.concatenate(
        [params["w_hr"], params["w_hz"], params["w_hn"]], axis=1).astype(matmul_dtype)
    b_i = jnp.concatenate([params["b_ir"], params["b_iz"], params["b_in"]], axis=1)
    b_h = jnp.concatenate([params["b_hr"], params["b_hz"], params["b_hn"]], axis=1)

    def step(h, inp):
        xt, mt = inp
        gx = jnp.dot(xt.astype(matmul_dtype), w_i,
                     preferred_element_type=jnp.float32) + b_i
        gh = jnp.dot(h.astype(matmul_dtype), w_h,
                     preferred_element_type=jnp.float32) + b_h
        r = jax.nn.sigmoid(gx[:, :H] + gh[:, :H])
        z = jax.nn.sigmoid(gx[:, H:2 * H] + gh[:, H:2 * H])
        n = jnp.tanh(gx[:, 2 * H:] + r * gh[:, 2 * H:])
        h_new = (1.0 - z) * n + z * h
        mt = mt[:, None]
        h_next = mt * h_new + (1.0 - mt) * h
        return h_next, mt * h_next

    h0 = jnp.zeros((B, H), jnp.float32)
    _, outs = jax.lax.scan(step, h0,
                           (jnp.transpose(x, (1, 0, 2)), jnp.transpose(mf, (1, 0))))
    out = jnp.transpose(outs, (1, 0, 2))
    if max_len is not None:
        out = out[:, :max_len, :]
    return out


def init_params(key, vocab_size, hidden_size):
    H = hidden_size
    keys = jax.random.split(key, 14)
    bound = 1.0 / np.sqrt(H)
    u = lambda k, shape: jax.random.uniform(k, shape, jnp.float32, -bound, bound)
    params = {
        "embedding": jax.random.normal(keys[0], (vocab_size, H), jnp.float32),
        # GRU weights stored pre-transposed so that x @ W gives the projection.
        "w_ir": u(keys[1], (H, H)), "w_iz": u(keys[2], (H, H)), "w_in": u(keys[3], (H, H)),
        "w_hr": u(keys[4], (H, H)), "w_hz": u(keys[5], (H, H)), "w_hn": u(keys[6], (H, H)),
        "b_ir": u(keys[7], (1, H)), "b_iz": u(keys[8], (1, H)), "b_in": u(keys[9], (1, H)),
        "b_hr": u(keys[10], (1, H)), "b_hz": u(keys[11], (1, H)), "b_hn": u(keys[12], (1, H)),
        # sentinel parameter exists in the module but is unused in forward()
        "sentinel": jax.random.uniform(keys[13], (H,), jnp.float32),
    }
    return params


if __name__ == "__main__":
    B, T, H, V = 2, 8, 32, 50

    key = jax.random.PRNGKey(0)
    k_par, k_tok = jax.random.split(key)
    params = init_params(k_par, V, H)

    tokens = jax.random.randint(k_tok, (B, T), 0, V, dtype=jnp.int32)
    # lengths sorted descending (pack_padded_sequence enforce_sorted=True),
    # known on the host so max_len is a static Python int (no device sync).
    lengths_host = np.array([8, 5], dtype=np.int32)
    mask = (jnp.arange(T)[None, :] < jnp.asarray(lengths_host)[:, None]).astype(jnp.int32)
    max_len = int(lengths_host.max())

    fwd = jax.jit(encoder_forward, static_argnames=("max_len", "chunk"))
    out = fwd(tokens, mask, params, max_len=max_len)
    out = jax.block_until_ready(out)

    ref = ref_forward(tokens, mask, params, max_len=max_len)
    assert out.shape == ref.shape == (B, max_len, H)
    np.testing.assert_allclose(np.asarray(out), np.asarray(ref), rtol=2e-3, atol=2e-3)

    print("KERNEL_OK")
</pallas_src>

<mosaic_0001>
module attributes {stable_mosaic.version = 11 : i64} {
  func.func @gru_kernel(%arg0: i32, %arg1: memref<8x2x32xbf16, #tpu.memory_space<vmem>>, %arg2: memref<2x1xf32, #tpu.memory_space<vmem>>, %arg3: memref<32x96xbf16, #tpu.memory_space<vmem>>, %arg4: memref<32x96xbf16, #tpu.memory_space<vmem>>, %arg5: memref<1x96xf32, #tpu.memory_space<vmem>>, %arg6: memref<1x96xf32, #tpu.memory_space<vmem>>, %arg7: memref<8x2x32xf32, #tpu.memory_space<vmem>>, %arg8: memref<2x32xf32, #tpu.memory_space<vmem>>) attributes {dimension_semantics = [#tpu.dimension_semantics<arbitrary>], iteration_bounds = array<i64: 1>, scalar_prefetch = 0 : i64, scratch_operands = 1 : i64, tpu.core_type = #tpu.core_type<tc>, window_params = [{transform_indices = @transform_0, window_bounds = array<i64: 8, 2, 32>}, {pipeline_mode = #tpu.pipeline_mode<synchronous>, transform_indices = @transform_1, window_bounds = array<i64: 2, 1>}, {pipeline_mode = #tpu.pipeline_mode<synchronous>, transform_indices = @transform_2, window_bounds = array<i64: 32, 96>}, {pipeline_mode = #tpu.pipeline_mode<synchronous>, transform_indices = @transform_3, window_bounds = array<i64: 32, 96>}, {pipeline_mode = #tpu.pipeline_mode<synchronous>, transform_indices = @transform_4, window_bounds = array<i64: 1, 96>}, {pipeline_mode = #tpu.pipeline_mode<synchronous>, transform_indices = @transform_5, window_bounds = array<i64: 1, 96>}, {transform_indices = @transform_6, window_bounds = array<i64: 8, 2, 32>}]} {
    %c0_i32 = arith.constant 0 : i32
    %0 = arith.cmpi eq, %arg0, %c0_i32 : i32
    %1 = arith.extui %0 : i1 to i32
    %c0_i32_0 = arith.constant 0 : i32
    %2 = arith.cmpi ne, %1, %c0_i32_0 : i32
    scf.if %2 {
      %cst_94 = arith.constant 0.000000e+00 : f32
      %402 = vector.broadcast %cst_94 : f32 to vector<2x32xf32>
      %c0_95 = arith.constant 0 : index
      %c0_96 = arith.constant 0 : index
      %403 = vector.load %arg8[%c0_95, %c0_96] : memref<2x32xf32, #tpu.memory_space<vmem>>, vector<2x32xf32>
      tpu.vector_store %arg8[%c0_95, %c0_96], %402 {strides = array<i32>} : memref<2x32xf32, #tpu.memory_space<vmem>>, vector<2x32xf32>,
    } else {
    }
    %c0 = arith.constant 0 : index
    %c0_1 = arith.constant 0 : index
    %3 = vector.load %arg2[%c0, %c0_1] : memref<2x1xf32, #tpu.memory_space<vmem>>, vector<2x1xf32>
    %c0_2 = arith.constant 0 : index
    %c0_3 = arith.constant 0 : index
    %4 = vector.load %arg3[%c0_2, %c0_3] : memref<32x96xbf16, #tpu.memory_space<vmem>>, vector<32x96xbf16>
    %c0_4 = arith.constant 0 : index
    %c0_5 = arith.constant 0 : index
    %5 = vector.load %arg4[%c0_4, %c0_5] : memref<32x96xbf16, #tpu.memory_space<vmem>>, vector<32x96xbf16>
    %c0_6 = arith.constant 0 : index
    %c0_7 = arith.constant 0 : index
    %6 = vector.load %arg5[%c0_6, %c0_7] : memref<1x96xf32, #tpu.memory_space<vmem>>, vector<1x96xf32>
    %c0_8 = arith.constant 0 : index
    %c0_9 = arith.constant 0 : index
    %7 = vector.load %arg6[%c0_8, %c0_9] : memref<1x96xf32, #tpu.memory_space<vmem>>, vector<1x96xf32>
    %c0_10 = arith.constant 0 : index
    %c0_11 = arith.constant 0 : index
    %8 = vector.load %arg8[%c0_10, %c0_11] : memref<2x32xf32, #tpu.memory_space<vmem>>, vector<2x32xf32>
    %c8_i32 = arith.constant 8 : i32
    %9 = arith.muli %arg0, %c8_i32 : i32
    %c0_i32_12 = arith.constant 0 : i32
    %10 = arith.addi %9, %c0_i32_12 : i32
    %11 = arith.sitofp %10 : i32 to f32
    %12 = vector.broadcast %11 : f32 to vector<2x1xf32>
    %13 = arith.cmpf ogt, %3, %12 : vector<2x1xf32>
    %14 = arith.extui %13 : vector<2x1xi1> to vector<2x1xi32>
    %15 = arith.sitofp %14 : vector<2x1xi32> to vector<2x1xf32>
    %c0_13 = arith.constant 0 : index
    %c0_14 = arith.constant 0 : index
    %c0_15 = arith.constant 0 : index
    %16 = vector.load %arg1[%c0_13, %c0_14, %c0_15] : memref<8x2x32xbf16, #tpu.memory_space<vmem>>, vector<1x2x32xbf16>
    %17 = vector.shape_cast %16 : vector<1x2x32xbf16> to vector<2x32xbf16>
    %cst = arith.constant dense<0.000000e+00> : vector<2x96xf32>
    %18 = tpu.matmul %17, %4, %cst {dimension_numbers = #tpu.dot_dimension_numbers<[1], [0], [0], [1], [0, 0, 1, 1], [], []>} : vector<2x32xbf16>, vector<32x96xbf16>, vector<2x96xf32> -> vector<2x96xf32>
    %19 = vector.broadcast %6 : vector<1x96xf32> to vector<2x96xf32>
    %20 = arith.addf %18, %19 : vector<2x96xf32>
    %21 = arith.truncf %8 : vector<2x32xf32> to vector<2x32xbf16>
    %cst_16 = arith.constant dense<0.000000e+00> : vector<2x96xf32>
    %22 = tpu.matmul %21, %5, %cst_16 {dimension_numbers = #tpu.dot_dimension_numbers<[1], [0], [0], [1], [0, 0, 1, 1], [], []>} : vector<2x32xbf16>, vector<32x96xbf16>, vector<2x96xf32> -> vector<2x96xf32>
    %23 = vector.broadcast %7 : vector<1x96xf32> to vector<2x96xf32>
    %24 = arith.addf %22, %23 : vector<2x96xf32>
    %25 = vector.extract_strided_slice %20 {offsets = [0, 0], sizes = [2, 32], strides = [1, 1]} : vector<2x96xf32> to vector<2x32xf32>
    %26 = vector.extract_strided_slice %24 {offsets = [0, 0], sizes = [2, 32], strides = [1, 1]} : vector<2x96xf32> to vector<2x32xf32>
    %27 = arith.addf %25, %26 : vector<2x32xf32>
    %28 = arith.negf %27 : vector<2x32xf32>
    %29 = math.exp %28 : vector<2x32xf32>
    %cst_17 = arith.constant 1.000000e+00 : f32
    %30 = vector.broadcast %cst_17 : f32 to vector<2x32xf32>
    %31 = arith.addf %30, %29 : vector<2x32xf32>
    %32 = arith.divf %30, %31 : vector<2x32xf32>
    %33 = vector.extract_strided_slice %20 {offsets = [0, 32], sizes = [2, 32], strides = [1, 1]} : vector<2x96xf32> to vector<2x32xf32>
    %34 = vector.extract_strided_slice %24 {offsets = [0, 32], sizes = [2, 32], strides = [1, 1]} : vector<2x96xf32> to vector<2x32xf32>
    %35 = arith.addf %33, %34 : vector<2x32xf32>
    %36 = arith.negf %35 : vector<2x32xf32>
    %37 = math.exp %36 : vector<2x32xf32>
    %cst_18 = arith.constant 1.000000e+00 : f32
    %38 = vector.broadcast %cst_18 : f32 to vector<2x32xf32>
    %39 = arith.addf %38, %37 : vector<2x32xf32>
    %40 = arith.divf %38, %39 : vector<2x32xf32>
    %41 = vector.extract_strided_slice %20 {offsets = [0, 64], sizes = [2, 32], strides = [1, 1]} : vector<2x96xf32> to vector<2x32xf32>
    %42 = vector.extract_strided_slice %24 {offsets = [0, 64], sizes = [2, 32], strides = [1, 1]} : vector<2x96xf32> to vector<2x32xf32>
    %43 = arith.mulf %32, %42 : vector<2x32xf32>
    %44 = arith.addf %41, %43 : vector<2x32xf32>
    %45 = math.tanh %44 : vector<2x32xf32>
    %46 = arith.subf %8, %45 : vector<2x32xf32>
    %47 = arith.mulf %40, %46 : vector<2x32xf32>
    %48 = arith.addf %45, %47 : vector<2x32xf32>
    %49 = arith.subf %48, %8 : vector<2x32xf32>
    %50 = vector.broadcast %15 : vector<2x1xf32> to vector<2x32xf32>
    %51 = arith.mulf %50, %49 : vector<2x32xf32>
    %52 = arith.addf %8, %51 : vector<2x32xf32>
    %53 = vector.broadcast %15 : vector<2x1xf32> to vector<2x32xf32>
    %54 = arith.mulf %53, %52 : vector<2x32xf32>
    %c0_19 = arith.constant 0 : index
    %c0_20 = arith.constant 0 : index
    %c0_21 = arith.constant 0 : index
    %55 = vector.load %arg7[%c0_19, %c0_20, %c0_21] : memref<8x2x32xf32, #tpu.memory_space<vmem>>, vector<1x2x32xf32>
    %56 = vector.shape_cast %55 : vector<1x2x32xf32> to vector<2x32xf32>
    %57 = vector.shape_cast %54 : vector<2x32xf32> to vector<1x2x32xf32>
    tpu.vector_store %arg7[%c0_19, %c0_20, %c0_21], %57 {strides = array<i32>} : memref<8x2x32xf32, #tpu.memory_space<vmem>>, vector<1x2x32xf32>,
    %c8_i32_22 = arith.constant 8 : i32
    %58 = arith.muli %arg0, %c8_i32_22 : i32
    %c1_i32 = arith.constant 1 : i32
    %59 = arith.addi %58, %c1_i32 : i32
    %60 = arith.sitofp %59 : i32 to f32
    %61 = vector.broadcast %60 : f32 to vector<2x1xf32>
    %62 = arith.cmpf ogt, %3, %61 : vector<2x1xf32>
    %63 = arith.extui %62 : vector<2x1xi1> to vector<2x1xi32>
    %64 = arith.sitofp %63 : vector<2x1xi32> to vector<2x1xf32>
    %c1 = arith.constant 1 : index
    %c0_23 = arith.constant 0 : index
    %c0_24 = arith.constant 0 : index
    %65 = vector.load %arg1[%c1, %c0_23, %c0_24] : memref<8x2x32xbf16, #tpu.memory_space<vmem>>, vector<1x2x32xbf16>
    %66 = vector.shape_cast %65 : vector<1x2x32xbf16> to vector<2x32xbf16>
    %cst_25 = arith.constant dense<0.000000e+00> : vector<2x96xf32>
    %67 = tpu.matmul %66, %4, %cst_25 {dimension_numbers = #tpu.dot_dimension_numbers<[1], [0], [0], [1], [0, 0, 1, 1], [], []>} : vector<2x32xbf16>, vector<32x96xbf16>, vector<2x96xf32> -> vector<2x96xf32>
    %68 = vector.broadcast %6 : vector<1x96xf32> to vector<2x96xf32>
    %69 = arith.addf %67, %68 : vector<2x96xf32>
    %70 = arith.truncf %52 : vector<2x32xf32> to vector<2x32xbf16>
    %cst_26 = arith.constant dense<0.000000e+00> : vector<2x96xf32>
    %71 = tpu.matmul %70, %5, %cst_26 {dimension_numbers = #tpu.dot_dimension_numbers<[1], [0], [0], [1], [0, 0, 1, 1], [], []>} : vector<2x32xbf16>, vector<32x96xbf16>, vector<2x96xf32> -> vector<2x96xf32>
    %72 = vector.broadcast %7 : vector<1x96xf32> to vector<2x96xf32>
    %73 = arith.addf %71, %72 : vector<2x96xf32>
    %74 = vector.extract_strided_slice %69 {offsets = [0, 0], sizes = [2, 32], strides = [1, 1]} : vector<2x96xf32> to vector<2x32xf32>
    %75 = vector.extract_strided_slice %73 {offsets = [0, 0], sizes = [2, 32], strides = [1, 1]} : vector<2x96xf32> to vector<2x32xf32>
    %76 = arith.addf %74, %75 : vector<2x32xf32>
    %77 = arith.negf %76 : vector<2x32xf32>
    %78 = math.exp %77 : vector<2x32xf32>
    %cst_27 = arith.constant 1.000000e+00 : f32
    %79 = vector.broadcast %cst_27 : f32 to vector<2x32xf32>
    %80 = arith.addf %79, %78 : vector<2x32xf32>
    %81 = arith.divf %79, %80 : vector<2x32xf32>
    %82 = vector.extract_strided_slice %69 {offsets = [0, 32], sizes = [2, 32], strides = [1, 1]} : vector<2x96xf32> to vector<2x32xf32>
    %83 = vector.extract_strided_slice %73 {offsets = [0, 32], sizes = [2, 32], strides = [1, 1]} : vector<2x96xf32> to vector<2x32xf32>
    %84 = arith.addf %82, %83 : vector<2x32xf32>
    %85 = arith.negf %84 : vector<2x32xf32>
    %86 = math.exp %85 : vector<2x32xf32>
    %cst_28 = arith.constant 1.000000e+00 : f32
    %87 = vector.broadcast %cst_28 : f32 to vector<2x32xf32>
    %88 = arith.addf %87, %86 : vector<2x32xf32>
    %89 = arith.divf %87, %88 : vector<2x32xf32>
    %90 = vector.extract_strided_slice %69 {offsets = [0, 64], sizes = [2, 32], strides = [1, 1]} : vector<2x96xf32> to vector<2x32xf32>
    %91 = vector.extract_strided_slice %73 {offsets = [0, 64], sizes = [2, 32], strides = [1, 1]} : vector<2x96xf32> to vector<2x32xf32>
    %92 = arith.mulf %81, %91 : vector<2x32xf32>
    %93 = arith.addf %90, %92 : vector<2x32xf32>
    %94 = math.tanh %93 : vector<2x32xf32>
    %95 = arith.subf %52, %94 : vector<2x32xf32>
    %96 = arith.mulf %89, %95 : vector<2x32xf32>
    %97 = arith.addf %94, %96 : vector<2x32xf32>
    %98 = arith.subf %97, %52 : vector<2x32xf32>
    %99 = vector.broadcast %64 : vector<2x1xf32> to vector<2x32xf32>
    %100 = arith.mulf %99, %98 : vector<2x32xf32>
    %101 = arith.addf %52, %100 : vector<2x32xf32>
    %102 = vector.broadcast %64 : vector<2x1xf32> to vector<2x32xf32>
    %103 = arith.mulf %102, %101 : vector<2x32xf32>
    %c1_29 = arith.constant 1 : index
    %c0_30 = arith.constant 0 : index
    %c0_31 = arith.constant 0 : index
    %104 = vector.load %arg7[%c1_29, %c0_30, %c0_31] : memref<8x2x32xf32, #tpu.memory_space<vmem>>, vector<1x2x32xf32>
    %105 = vector.shape_cast %104 : vector<1x2x32xf32> to vector<2x32xf32>
    %106 = vector.shape_cast %103 : vector<2x32xf32> to vector<1x2x32xf32>
    tpu.vector_store %arg7[%c1_29, %c0_30, %c0_31], %106 {strides = array<i32>} : memref<8x2x32xf32, #tpu.memory_space<vmem>>, vector<1x2x32xf32>,
    %c8_i32_32 = arith.constant 8 : i32
    %107 = arith.muli %arg0, %c8_i32_32 : i32
    %c2_i32 = arith.constant 2 : i32
    %108 = arith.addi %107, %c2_i32 : i32
    %109 = arith.sitofp %108 : i32 to f32
    %110 = vector.broadcast %109 : f32 to vector<2x1xf32>
    %111 = arith.cmpf ogt, %3, %110 : vector<2x1xf32>
    %112 = arith.extui %111 : vector<2x1xi1> to vector<2x1xi32>
    %113 = arith.sitofp %112 : vector<2x1xi32> to vector<2x1xf32>
    %c2 = arith.constant 2 : index
    %c0_33 = arith.constant 0 : index
    %c0_34 = arith.constant 0 : index
    %114 = vector.load %arg1[%c2, %c0_33, %c0_34] : memref<8x2x32xbf16, #tpu.memory_space<vmem>>, vector<1x2x32xbf16>
    %115 = vector.shape_cast %114 : vector<1x2x32xbf16> to vector<2x32xbf16>
    %cst_35 = arith.constant dense<0.000000e+00> : vector<2x96xf32>
    %116 = tpu.matmul %115, %4, %cst_35 {dimension_numbers = #tpu.dot_dimension_numbers<[1], [0], [0], [1], [0, 0, 1, 1], [], []>} : vector<2x32xbf16>, vector<32x96xbf16>, vector<2x96xf32> -> vector<2x96xf32>
    %117 = vector.broadcast %6 : vector<1x96xf32> to vector<2x96xf32>
    %118 = arith.addf %116, %117 : vector<2x96xf32>
    %119 = arith.truncf %101 : vector<2x32xf32> to vector<2x32xbf16>
    %cst_36 = arith.constant dense<0.000000e+00> : vector<2x96xf32>
    %120 = tpu.matmul %119, %5, %cst_36 {dimension_numbers = #tpu.dot_dimension_numbers<[1], [0], [0], [1], [0, 0, 1, 1], [], []>} : vector<2x32xbf16>, vector<32x96xbf16>, vector<2x96xf32> -> vector<2x96xf32>
    %121 = vector.broadcast %7 : vector<1x96xf32> to vector<2x96xf32>
    %122 = arith.addf %120, %121 : vector<2x96xf32>
    %123 = vector.extract_strided_slice %118 {offsets = [0, 0], sizes = [2, 32], strides = [1, 1]} : vector<2x96xf32> to vector<2x32xf32>
    %124 = vector.extract_strided_slice %122 {offsets = [0, 0], sizes = [2, 32], strides = [1, 1]} : vector<2x96xf32> to vector<2x32xf32>
    %125 = arith.addf %123, %124 : vector<2x32xf32>
    %126 = arith.negf %125 : vector<2x32xf32>
    %127 = math.exp %126 : vector<2x32xf32>
    %cst_37 = arith.constant 1.000000e+00 : f32
    %128 = vector.broadcast %cst_37 : f32 to vector<2x32xf32>
    %129 = arith.addf %128, %127 : vector<2x32xf32>
    %130 = arith.divf %128, %129 : vector<2x32xf32>
    %131 = vector.extract_strided_slice %118 {offsets = [0, 32], sizes = [2, 32], strides = [1, 1]} : vector<2x96xf32> to vector<2x32xf32>
    %132 = vector.extract_strided_slice %122 {offsets = [0, 32], sizes = [2, 32], strides = [1, 1]} : vector<2x96xf32> to vector<2x32xf32>
    %133 = arith.addf %131, %132 : vector<2x32xf32>
    %134 = arith.negf %133 : vector<2x32xf32>
    %135 = math.exp %134 : vector<2x32xf32>
    %cst_38 = arith.constant 1.000000e+00 : f32
    %136 = vector.broadcast %cst_38 : f32 to vector<2x32xf32>
    %137 = arith.addf %136, %135 : vector<2x32xf32>
    %138 = arith.divf %136, %137 : vector<2x32xf32>
    %139 = vector.extract_strided_slice %118 {offsets = [0, 64], sizes = [2, 32], strides = [1, 1]} : vector<2x96xf32> to vector<2x32xf32>
    %140 = vector.extract_strided_slice %122 {offsets = [0, 64], sizes = [2, 32], strides = [1, 1]} : vector<2x96xf32> to vector<2x32xf32>
    %141 = arith.mulf %130, %140 : vector<2x32xf32>
    %142 = arith.addf %139, %141 : vector<2x32xf32>
    %143 = math.tanh %142 : vector<2x32xf32>
    %144 = arith.subf %101, %143 : vector<2x32xf32>
    %145 = arith.mulf %138, %144 : vector<2x32xf32>
    %146 = arith.addf %143, %145 : vector<2x32xf32>
    %147 = arith.subf %146, %101 : vector<2x32xf32>
    %148 = vector.broadcast %113 : vector<2x1xf32> to vector<2x32xf32>
    %149 = arith.mulf %148, %147 : vector<2x32xf32>
    %150 = arith.addf %101, %149 : vector<2x32xf32>
    %151 = vector.broadcast %113 : vector<2x1xf32> to vector<2x32xf32>
    %152 = arith.mulf %151, %150 : vector<2x32xf32>
    %c2_39 = arith.constant 2 : index
    %c0_40 = arith.constant 0 : index
    %c0_41 = arith.constant 0 : index
    %153 = vector.load %arg7[%c2_39, %c0_40, %c0_41] : memref<8x2x32xf32, #tpu.memory_space<vmem>>, vector<1x2x32xf32>
    %154 = vector.shape_cast %153 : vector<1x2x32xf32> to vector<2x32xf32>
    %155 = vector.shape_cast %152 : vector<2x32xf32> to vector<1x2x32xf32>
    tpu.vector_store %arg7[%c2_39, %c0_40, %c0_41], %155 {strides = array<i32>} : memref<8x2x32xf32, #tpu.memory_space<vmem>>, vector<1x2x32xf32>,
    %c8_i32_42 = arith.constant 8 : i32
    %156 = arith.muli %arg0, %c8_i32_42 : i32
    %c3_i32 = arith.constant 3 : i32
    %157 = arith.addi %156, %c3_i32 : i32
    %158 = arith.sitofp %157 : i32 to f32
    %159 = vector.broadcast %158 : f32 to vector<2x1xf32>
    %160 = arith.cmpf ogt, %3, %159 : vector<2x1xf32>
    %161 = arith.extui %160 : vector<2x1xi1> to vector<2x1xi32>
    %162 = arith.sitofp %161 : vector<2x1xi32> to vector<2x1xf32>
    %c3 = arith.constant 3 : index
    %c0_43 = arith.constant 0 : index
    %c0_44 = arith.constant 0 : index
    %163 = vector.load %arg1[%c3, %c0_43, %c0_44] : memref<8x2x32xbf16, #tpu.memory_space<vmem>>, vector<1x2x32xbf16>
    %164 = vector.shape_cast %163 : vector<1x2x32xbf16> to vector<2x32xbf16>
    %cst_45 = arith.constant dense<0.000000e+00> : vector<2x96xf32>
    %165 = tpu.matmul %164, %4, %cst_45 {dimension_numbers = #tpu.dot_dimension_numbers<[1], [0], [0], [1], [0, 0, 1, 1], [], []>} : vector<2x32xbf16>, vector<32x96xbf16>, vector<2x96xf32> -> vector<2x96xf32>
    %166 = vector.broadcast %6 : vector<1x96xf32> to vector<2x96xf32>
    %167 = arith.addf %165, %166 : vector<2x96xf32>
    %168 = arith.truncf %150 : vector<2x32xf32> to vector<2x32xbf16>
    %cst_46 = arith.constant dense<0.000000e+00> : vector<2x96xf32>
    %169 = tpu.matmul %168, %5, %cst_46 {dimension_numbers = #tpu.dot_dimension_numbers<[1], [0], [0], [1], [0, 0, 1, 1], [], []>} : vector<2x32xbf16>, vector<32x96xbf16>, vector<2x96xf32> -> vector<2x96xf32>
    %170 = vector.broadcast %7 : vector<1x96xf32> to vector<2x96xf32>
    %171 = arith.addf %169, %170 : vector<2x96xf32>
    %172 = vector.extract_strided_slice %167 {offsets = [0, 0], sizes = [2, 32], strides = [1, 1]} : vector<2x96xf32> to vector<2x32xf32>
    %173 = vector.extract_strided_slice %171 {offsets = [0, 0], sizes = [2, 32], strides = [1, 1]} : vector<2x96xf32> to vector<2x32xf32>
    %174 = arith.addf %172, %173 : vector<2x32xf32>
    %175 = arith.negf %174 : vector<2x32xf32>
    %176 = math.exp %175 : vector<2x32xf32>
    %cst_47 = arith.constant 1.000000e+00 : f32
    %177 = vector.broadcast %cst_47 : f32 to vector<2x32xf32>
    %178 = arith.addf %177, %176 : vector<2x32xf32>
    %179 = arith.divf %177, %178 : vector<2x32xf32>
    %180 = vector.extract_strided_slice %167 {offsets = [0, 32], sizes = [2, 32], strides = [1, 1]} : vector<2x96xf32> to vector<2x32xf32>
    %181 = vector.extract_strided_slice %171 {offsets = [0, 32], sizes = [2, 32], strides = [1, 1]} : vector<2x96xf32> to vector<2x32xf32>
    %182 = arith.addf %180, %181 : vector<2x32xf32>
    %183 = arith.negf %182 : vector<2x32xf32>
    %184 = math.exp %183 : vector<2x32xf32>
    %cst_48 = arith.constant 1.000000e+00 : f32
    %185 = vector.broadcast %cst_48 : f32 to vector<2x32xf32>
    %186 = arith.addf %185, %184 : vector<2x32xf32>
    %187 = arith.divf %185, %186 : vector<2x32xf32>
    %188 = vector.extract_strided_slice %167 {offsets = [0, 64], sizes = [2, 32], strides = [1, 1]} : vector<2x96xf32> to vector<2x32xf32>
    %189 = vector.extract_strided_slice %171 {offsets = [0, 64], sizes = [2, 32], strides = [1, 1]} : vector<2x96xf32> to vector<2x32xf32>
    %190 = arith.mulf %179, %189 : vector<2x32xf32>
    %191 = arith.addf %188, %190 : vector<2x32xf32>
    %192 = math.tanh %191 : vector<2x32xf32>
    %193 = arith.subf %150, %192 : vector<2x32xf32>
    %194 = arith.mulf %187, %193 : vector<2x32xf32>
    %195 = arith.addf %192, %194 : vector<2x32xf32>
    %196 = arith.subf %195, %150 : vector<2x32xf32>
    %197 = vector.broadcast %162 : vector<2x1xf32> to vector<2x32xf32>
    %198 = arith.mulf %197, %196 : vector<2x32xf32>
    %199 = arith.addf %150, %198 : vector<2x32xf32>
    %200 = vector.broadcast %162 : vector<2x1xf32> to vector<2x32xf32>
    %201 = arith.mulf %200, %199 : vector<2x32xf32>
    %c3_49 = arith.constant 3 : index
    %c0_50 = arith.constant 0 : index
    %c0_51 = arith.constant 0 : index
    %202 = vector.load %arg7[%c3_49, %c0_50, %c0_51] : memref<8x2x32xf32, #tpu.memory_space<vmem>>, vector<1x2x32xf32>
    %203 = vector.shape_cast %202 : vector<1x2x32xf32> to vector<2x32xf32>
    %204 = vector.shape_cast %201 : vector<2x32xf32> to vector<1x2x32xf32>
    tpu.vector_store %arg7[%c3_49, %c0_50, %c0_51], %204 {strides = array<i32>} : memref<8x2x32xf32, #tpu.memory_space<vmem>>, vector<1x2x32xf32>,
    %c8_i32_52 = arith.constant 8 : i32
    %205 = arith.muli %arg0, %c8_i32_52 : i32
    %c4_i32 = arith.constant 4 : i32
    %206 = arith.addi %205, %c4_i32 : i32
    %207 = arith.sitofp %206 : i32 to f32
    %208 = vector.broadcast %207 : f32 to vector<2x1xf32>
    %209 = arith.cmpf ogt, %3, %208 : vector<2x1xf32>
    %210 = arith.extui %209 : vector<2x1xi1> to vector<2x1xi32>
    %211 = arith.sitofp %210 : vector<2x1xi32> to vector<2x1xf32>
    %c4 = arith.constant 4 : index
    %c0_53 = arith.constant 0 : index
    %c0_54 = arith.constant 0 : index
    %212 = vector.load %arg1[%c4, %c0_53, %c0_54] : memref<8x2x32xbf16, #tpu.memory_space<vmem>>, vector<1x2x32xbf16>
    %213 = vector.shape_cast %212 : vector<1x2x32xbf16> to vector<2x32xbf16>
    %cst_55 = arith.constant dense<0.000000e+00> : vector<2x96xf32>
    %214 = tpu.matmul %213, %4, %cst_55 {dimension_numbers = #tpu.dot_dimension_numbers<[1], [0], [0], [1], [0, 0, 1, 1], [], []>} : vector<2x32xbf16>, vector<32x96xbf16>, vector<2x96xf32> -> vector<2x96xf32>
    %215 = vector.broadcast %6 : vector<1x96xf32> to vector<2x96xf32>
    %216 = arith.addf %214, %215 : vector<2x96xf32>
    %217 = arith.truncf %199 : vector<2x32xf32> to vector<2x32xbf16>
    %cst_56 = arith.constant dense<0.000000e+00> : vector<2x96xf32>
    %218 = tpu.matmul %217, %5, %cst_56 {dimension_numbers = #tpu.dot_dimension_numbers<[1], [0], [0], [1], [0, 0, 1, 1], [], []>} : vector<2x32xbf16>, vector<32x96xbf16>, vector<2x96xf32> -> vector<2x96xf32>
    %219 = vector.broadcast %7 : vector<1x96xf32> to vector<2x96xf32>
    %220 = arith.addf %218, %219 : vector<2x96xf32>
    %221 = vector.extract_strided_slice %216 {offsets = [0, 0], sizes = [2, 32], strides = [1, 1]} : vector<2x96xf32> to vector<2x32xf32>
    %222 = vector.extract_strided_slice %220 {offsets = [0, 0], sizes = [2, 32], strides = [1, 1]} : vector<2x96xf32> to vector<2x32xf32>
    %223 = arith.addf %221, %222 : vector<2x32xf32>
    %224 = arith.negf %223 : vector<2x32xf32>
    %225 = math.exp %224 : vector<2x32xf32>
    %cst_57 = arith.constant 1.000000e+00 : f32
    %226 = vector.broadcast %cst_57 : f32 to vector<2x32xf32>
    %227 = arith.addf %226, %225 : vector<2x32xf32>
    %228 = arith.divf %226, %227 : vector<2x32xf32>
    %229 = vector.extract_strided_slice %216 {offsets = [0, 32], sizes = [2, 32], strides = [1, 1]} : vector<2x96xf32> to vector<2x32xf32>
    %230 = vector.extract_strided_slice %220 {offsets = [0, 32], sizes = [2, 32], strides = [1, 1]} : vector<2x96xf32> to vector<2x32xf32>
    %231 = arith.addf %229, %230 : vector<2x32xf32>
    %232 = arith.negf %231 : vector<2x32xf32>
    %233 = math.exp %232 : vector<2x32xf32>
    %cst_58 = arith.constant 1.000000e+00 : f32
    %234 = vector.broadcast %cst_58 : f32 to vector<2x32xf32>
    %235 = arith.addf %234, %233 : vector<2x32xf32>
    %236 = arith.divf %234, %235 : vector<2x32xf32>
    %237 = vector.extract_strided_slice %216 {offsets = [0, 64], sizes = [2, 32], strides = [1, 1]} : vector<2x96xf32> to vector<2x32xf32>
    %238 = vector.extract_strided_slice %220 {offsets = [0, 64], sizes = [2, 32], strides = [1, 1]} : vector<2x96xf32> to vector<2x32xf32>
    %239 = arith.mulf %228, %238 : vector<2x32xf32>
    %240 = arith.addf %237, %239 : vector<2x32xf32>
    %241 = math.tanh %240 : vector<2x32xf32>
    %242 = arith.subf %199, %241 : vector<2x32xf32>
    %243 = arith.mulf %236, %242 : vector<2x32xf32>
    %244 = arith.addf %241, %243 : vector<2x32xf32>
    %245 = arith.subf %244, %199 : vector<2x32xf32>
    %246 = vector.broadcast %211 : vector<2x1xf32> to vector<2x32xf32>
    %247 = arith.mulf %246, %245 : vector<2x32xf32>
    %248 = arith.addf %199, %247 : vector<2x32xf32>
    %249 = vector.broadcast %211 : vector<2x1xf32> to vector<2x32xf32>
    %250 = arith.mulf %249, %248 : vector<2x32xf32>
    %c4_59 = arith.constant 4 : index
    %c0_60 = arith.constant 0 : index
    %c0_61 = arith.constant 0 : index
    %251 = vector.load %arg7[%c4_59, %c0_60, %c0_61] : memref<8x2x32xf32, #tpu.memory_space<vmem>>, vector<1x2x32xf32>
    %252 = vector.shape_cast %251 : vector<1x2x32xf32> to vector<2x32xf32>
    %253 = vector.shape_cast %250 : vector<2x32xf32> to vector<1x2x32xf32>
    tpu.vector_store %arg7[%c4_59, %c0_60, %c0_61], %253 {strides = array<i32>} : memref<8x2x32xf32, #tpu.memory_space<vmem>>, vector<1x2x32xf32>,
    %c8_i32_62 = arith.constant 8 : i32
    %254 = arith.muli %arg0, %c8_i32_62 : i32
    %c5_i32 = arith.constant 5 : i32
    %255 = arith.addi %254, %c5_i32 : i32
    %256 = arith.sitofp %255 : i32 to f32
    %257 = vector.broadcast %256 : f32 to vector<2x1xf32>
    %258 = arith.cmpf ogt, %3, %257 : vector<2x1xf32>
    %259 = arith.extui %258 : vector<2x1xi1> to vector<2x1xi32>
    %260 = arith.sitofp %259 : vector<2x1xi32> to vector<2x1xf32>
    %c5 = arith.constant 5 : index
    %c0_63 = arith.constant 0 : index
    %c0_64 = arith.constant 0 : index
    %261 = vector.load %arg1[%c5, %c0_63, %c0_64] : memref<8x2x32xbf16, #tpu.memory_space<vmem>>, vector<1x2x32xbf16>
    %262 = vector.shape_cast %261 : vector<1x2x32xbf16> to vector<2x32xbf16>
    %cst_65 = arith.constant dense<0.000000e+00> : vector<2x96xf32>
    %263 = tpu.matmul %262, %4, %cst_65 {dimension_numbers = #tpu.dot_dimension_numbers<[1], [0], [0], [1], [0, 0, 1, 1], [], []>} : vector<2x32xbf16>, vector<32x96xbf16>, vector<2x96xf32> -> vector<2x96xf32>
    %264 = vector.broadcast %6 : vector<1x96xf32> to vector<2x96xf32>
    %265 = arith.addf %263, %264 : vector<2x96xf32>
    %266 = arith.truncf %248 : vector<2x32xf32> to vector<2x32xbf16>
    %cst_66 = arith.constant dense<0.000000e+00> : vector<2x96xf32>
    %267 = tpu.matmul %266, %5, %cst_66 {dimension_numbers = #tpu.dot_dimension_numbers<[1], [0], [0], [1], [0, 0, 1, 1], [], []>} : vector<2x32xbf16>, vector<32x96xbf16>, vector<2x96xf32> -> vector<2x96xf32>
    %268 = vector.broadcast %7 : vector<1x96xf32> to vector<2x96xf32>
    %269 = arith.addf %267, %268 : vector<2x96xf32>
    %270 = vector.extract_strided_slice %265 {offsets = [0, 0], sizes = [2, 32], strides = [1, 1]} : vector<2x96xf32> to vector<2x32xf32>
    %271 = vector.extract_strided_slice %269 {offsets = [0, 0], sizes = [2, 32], strides = [1, 1]} : vector<2x96xf32> to vector<2x32xf32>
    %272 = arith.addf %270, %271 : vector<2x32xf32>
    %273 = arith.negf %272 : vector<2x32xf32>
    %274 = math.exp %273 : vector<2x32xf32>
    %cst_67 = arith.constant 1.000000e+00 : f32
    %275 = vector.broadcast %cst_67 : f32 to vector<2x32xf32>
    %276 = arith.addf %275, %274 : vector<2x32xf32>
    %277 = arith.divf %275, %276 : vector<2x32xf32>
    %278 = vector.extract_strided_slice %265 {offsets = [0, 32], sizes = [2, 32], strides = [1, 1]} : vector<2x96xf32> to vector<2x32xf32>
    %279 = vector.extract_strided_slice %269 {offsets = [0, 32], sizes = [2, 32], strides = [1, 1]} : vector<2x96xf32> to vector<2x32xf32>
    %280 = arith.addf %278, %279 : vector<2x32xf32>
    %281 = arith.negf %280 : vector<2x32xf32>
    %282 = math.exp %281 : vector<2x32xf32>
    %cst_68 = arith.constant 1.000000e+00 : f32
    %283 = vector.broadcast %cst_68 : f32 to vector<2x32xf32>
    %284 = arith.addf %283, %282 : vector<2x32xf32>
    %285 = arith.divf %283, %284 : vector<2x32xf32>
    %286 = vector.extract_strided_slice %265 {offsets = [0, 64], sizes = [2, 32], strides = [1, 1]} : vector<2x96xf32> to vector<2x32xf32>
    %287 = vector.extract_strided_slice %269 {offsets = [0, 64], sizes = [2, 32], strides = [1, 1]} : vector<2x96xf32> to vector<2x32xf32>
    %288 = arith.mulf %277, %287 : vector<2x32xf32>
    %289 = arith.addf %286, %288 : vector<2x32xf32>
    %290 = math.tanh %289 : vector<2x32xf32>
    %291 = arith.subf %248, %290 : vector<2x32xf32>
    %292 = arith.mulf %285, %291 : vector<2x32xf32>
    %293 = arith.addf %290, %292 : vector<2x32xf32>
    %294 = arith.subf %293, %248 : vector<2x32xf32>
    %295 = vector.broadcast %260 : vector<2x1xf32> to vector<2x32xf32>
    %296 = arith.mulf %295, %294 : vector<2x32xf32>
    %297 = arith.addf %248, %296 : vector<2x32xf32>
    %298 = vector.broadcast %260 : vector<2x1xf32> to vector<2x32xf32>
    %299 = arith.mulf %298, %297 : vector<2x32xf32>
    %c5_69 = arith.constant 5 : index
    %c0_70 = arith.constant 0 : index
    %c0_71 = arith.constant 0 : index
    %300 = vector.load %arg7[%c5_69, %c0_70, %c0_71] : memref<8x2x32xf32, #tpu.memory_space<vmem>>, vector<1x2x32xf32>
    %301 = vector.shape_cast %300 : vector<1x2x32xf32> to vector<2x32xf32>
    %302 = vector.shape_cast %299 : vector<2x32xf32> to vector<1x2x32xf32>
    tpu.vector_store %arg7[%c5_69, %c0_70, %c0_71], %302 {strides = array<i32>} : memref<8x2x32xf32, #tpu.memory_space<vmem>>, vector<1x2x32xf32>,
    %c8_i32_72 = arith.constant 8 : i32
    %303 = arith.muli %arg0, %c8_i32_72 : i32
    %c6_i32 = arith.constant 6 : i32
    %304 = arith.addi %303, %c6_i32 : i32
    %305 = arith.sitofp %304 : i32 to f32
    %306 = vector.broadcast %305 : f32 to vector<2x1xf32>
    %307 = arith.cmpf ogt, %3, %306 : vector<2x1xf32>
    %308 = arith.extui %307 : vector<2x1xi1> to vector<2x1xi32>
    %309 = arith.sitofp %308 : vector<2x1xi32> to vector<2x1xf32>
    %c6 = arith.constant 6 : index
    %c0_73 = arith.constant 0 : index
    %c0_74 = arith.constant 0 : index
    %310 = vector.load %arg1[%c6, %c0_73, %c0_74] : memref<8x2x32xbf16, #tpu.memory_space<vmem>>, vector<1x2x32xbf16>
    %311 = vector.shape_cast %310 : vector<1x2x32xbf16> to vector<2x32xbf16>
    %cst_75 = arith.constant dense<0.000000e+00> : vector<2x96xf32>
    %312 = tpu.matmul %311, %4, %cst_75 {dimension_numbers = #tpu.dot_dimension_numbers<[1], [0], [0], [1], [0, 0, 1, 1], [], []>} : vector<2x32xbf16>, vector<32x96xbf16>, vector<2x96xf32> -> vector<2x96xf32>
    %313 = vector.broadcast %6 : vector<1x96xf32> to vector<2x96xf32>
    %314 = arith.addf %312, %313 : vector<2x96xf32>
    %315 = arith.truncf %297 : vector<2x32xf32> to vector<2x32xbf16>
    %cst_76 = arith.constant dense<0.000000e+00> : vector<2x96xf32>
    %316 = tpu.matmul %315, %5, %cst_76 {dimension_numbers = #tpu.dot_dimension_numbers<[1], [0], [0], [1], [0, 0, 1, 1], [], []>} : vector<2x32xbf16>, vector<32x96xbf16>, vector<2x96xf32> -> vector<2x96xf32>
    %317 = vector.broadcast %7 : vector<1x96xf32> to vector<2x96xf32>
    %318 = arith.addf %316, %317 : vector<2x96xf32>
    %319 = vector.extract_strided_slice %314 {offsets = [0, 0], sizes = [2, 32], strides = [1, 1]} : vector<2x96xf32> to vector<2x32xf32>
    %320 = vector.extract_strided_slice %318 {offsets = [0, 0], sizes = [2, 32], strides = [1, 1]} : vector<2x96xf32> to vector<2x32xf32>
    %321 = arith.addf %319, %320 : vector<2x32xf32>
    %322 = arith.negf %321 : vector<2x32xf32>
    %323 = math.exp %322 : vector<2x32xf32>
    %cst_77 = arith.constant 1.000000e+00 : f32
    %324 = vector.broadcast %cst_77 : f32 to vector<2x32xf32>
    %325 = arith.addf %324, %323 : vector<2x32xf32>
    %326 = arith.divf %324, %325 : vector<2x32xf32>
    %327 = vector.extract_strided_slice %314 {offsets = [0, 32], sizes = [2, 32], strides = [1, 1]} : vector<2x96xf32> to vector<2x32xf32>
    %328 = vector.extract_strided_slice %318 {offsets = [0, 32], sizes = [2, 32], strides = [1, 1]} : vector<2x96xf32> to vector<2x32xf32>
    %329 = arith.addf %327, %328 : vector<2x32xf32>
    %330 = arith.negf %329 : vector<2x32xf32>
    %331 = math.exp %330 : vector<2x32xf32>
    %cst_78 = arith.constant 1.000000e+00 : f32
    %332 = vector.broadcast %cst_78 : f32 to vector<2x32xf32>
    %333 = arith.addf %332, %331 : vector<2x32xf32>
    %334 = arith.divf %332, %333 : vector<2x32xf32>
    %335 = vector.extract_strided_slice %314 {offsets = [0, 64], sizes = [2, 32], strides = [1, 1]} : vector<2x96xf32> to vector<2x32xf32>
    %336 = vector.extract_strided_slice %318 {offsets = [0, 64], sizes = [2, 32], strides = [1, 1]} : vector<2x96xf32> to vector<2x32xf32>
    %337 = arith.mulf %326, %336 : vector<2x32xf32>
    %338 = arith.addf %335, %337 : vector<2x32xf32>
    %339 = math.tanh %338 : vector<2x32xf32>
    %340 = arith.subf %297, %339 : vector<2x32xf32>
    %341 = arith.mulf %334, %340 : vector<2x32xf32>
    %342 = arith.addf %339, %341 : vector<2x32xf32>
    %343 = arith.subf %342, %297 : vector<2x32xf32>
    %344 = vector.broadcast %309 : vector<2x1xf32> to vector<2x32xf32>
    %345 = arith.mulf %344, %343 : vector<2x32xf32>
    %346 = arith.addf %297, %345 : vector<2x32xf32>
    %347 = vector.broadcast %309 : vector<2x1xf32> to vector<2x32xf32>
    %348 = arith.mulf %347, %346 : vector<2x32xf32>
    %c6_79 = arith.constant 6 : index
    %c0_80 = arith.constant 0 : index
    %c0_81 = arith.constant 0 : index
    %349 = vector.load %arg7[%c6_79, %c0_80, %c0_81] : memref<8x2x32xf32, #tpu.memory_space<vmem>>, vector<1x2x32xf32>
    %350 = vector.shape_cast %349 : vector<1x2x32xf32> to vector<2x32xf32>
    %351 = vector.shape_cast %348 : vector<2x32xf32> to vector<1x2x32xf32>
    tpu.vector_store %arg7[%c6_79, %c0_80, %c0_81], %351 {strides = array<i32>} : memref<8x2x32xf32, #tpu.memory_space<vmem>>, vector<1x2x32xf32>,
    %c8_i32_82 = arith.constant 8 : i32
    %352 = arith.muli %arg0, %c8_i32_82 : i32
    %c7_i32 = arith.constant 7 : i32
    %353 = arith.addi %352, %c7_i32 : i32
    %354 = arith.sitofp %353 : i32 to f32
    %355 = vector.broadcast %354 : f32 to vector<2x1xf32>
    %356 = arith.cmpf ogt, %3, %355 : vector<2x1xf32>
    %357 = arith.extui %356 : vector<2x1xi1> to vector<2x1xi32>
    %358 = arith.sitofp %357 : vector<2x1xi32> to vector<2x1xf32>
    %c7 = arith.constant 7 : index
    %c0_83 = arith.constant 0 : index
    %c0_84 = arith.constant 0 : index
    %359 = vector.load %arg1[%c7, %c0_83, %c0_84] : memref<8x2x32xbf16, #tpu.memory_space<vmem>>, vector<1x2x32xbf16>
    %360 = vector.shape_cast %359 : vector<1x2x32xbf16> to vector<2x32xbf16>
    %cst_85 = arith.constant dense<0.000000e+00> : vector<2x96xf32>
    %361 = tpu.matmul %360, %4, %cst_85 {dimension_numbers = #tpu.dot_dimension_numbers<[1], [0], [0], [1], [0, 0, 1, 1], [], []>} : vector<2x32xbf16>, vector<32x96xbf16>, vector<2x96xf32> -> vector<2x96xf32>
    %362 = vector.broadcast %6 : vector<1x96xf32> to vector<2x96xf32>
    %363 = arith.addf %361, %362 : vector<2x96xf32>
    %364 = arith.truncf %346 : vector<2x32xf32> to vector<2x32xbf16>
    %cst_86 = arith.constant dense<0.000000e+00> : vector<2x96xf32>
    %365 = tpu.matmul %364, %5, %cst_86 {dimension_numbers = #tpu.dot_dimension_numbers<[1], [0], [0], [1], [0, 0, 1, 1], [], []>} : vector<2x32xbf16>, vector<32x96xbf16>, vector<2x96xf32> -> vector<2x96xf32>
    %366 = vector.broadcast %7 : vector<1x96xf32> to vector<2x96xf32>
    %367 = arith.addf %365, %366 : vector<2x96xf32>
    %368 = vector.extract_strided_slice %363 {offsets = [0, 0], sizes = [2, 32], strides = [1, 1]} : vector<2x96xf32> to vector<2x32xf32>
    %369 = vector.extract_strided_slice %367 {offsets = [0, 0], sizes = [2, 32], strides = [1, 1]} : vector<2x96xf32> to vector<2x32xf32>
    %370 = arith.addf %368, %369 : vector<2x32xf32>
    %371 = arith.negf %370 : vector<2x32xf32>
    %372 = math.exp %371 : vector<2x32xf32>
    %cst_87 = arith.constant 1.000000e+00 : f32
    %373 = vector.broadcast %cst_87 : f32 to vector<2x32xf32>
    %374 = arith.addf %373, %372 : vector<2x32xf32>
    %375 = arith.divf %373, %374 : vector<2x32xf32>
    %376 = vector.extract_strided_slice %363 {offsets = [0, 32], sizes = [2, 32], strides = [1, 1]} : vector<2x96xf32> to vector<2x32xf32>
    %377 = vector.extract_strided_slice %367 {offsets = [0, 32], sizes = [2, 32], strides = [1, 1]} : vector<2x96xf32> to vector<2x32xf32>
    %378 = arith.addf %376, %377 : vector<2x32xf32>
    %379 = arith.negf %378 : vector<2x32xf32>
    %380 = math.exp %379 : vector<2x32xf32>
    %cst_88 = arith.constant 1.000000e+00 : f32
    %381 = vector.broadcast %cst_88 : f32 to vector<2x32xf32>
    %382 = arith.addf %381, %380 : vector<2x32xf32>
    %383 = arith.divf %381, %382 : vector<2x32xf32>
    %384 = vector.extract_strided_slice %363 {offsets = [0, 64], sizes = [2, 32], strides = [1, 1]} : vector<2x96xf32> to vector<2x32xf32>
    %385 = vector.extract_strided_slice %367 {offsets = [0, 64], sizes = [2, 32], strides = [1, 1]} : vector<2x96xf32> to vector<2x32xf32>
    %386 = arith.mulf %375, %385 : vector<2x32xf32>
    %387 = arith.addf %384, %386 : vector<2x32xf32>
    %388 = math.tanh %387 : vector<2x32xf32>
    %389 = arith.subf %346, %388 : vector<2x32xf32>
    %390 = arith.mulf %383, %389 : vector<2x32xf32>
    %391 = arith.addf %388, %390 : vector<2x32xf32>
    %392 = arith.subf %391, %346 : vector<2x32xf32>
    %393 = vector.broadcast %358 : vector<2x1xf32> to vector<2x32xf32>
    %394 = arith.mulf %393, %392 : vector<2x32xf32>
    %395 = arith.addf %346, %394 : vector<2x32xf32>
    %396 = vector.broadcast %358 : vector<2x1xf32> to vector<2x32xf32>
    %397 = arith.mulf %396, %395 : vector<2x32xf32>
    %c7_89 = arith.constant 7 : index
    %c0_90 = arith.constant 0 : index
    %c0_91 = arith.constant 0 : index
    %398 = vector.load %arg7[%c7_89, %c0_90, %c0_91] : memref<8x2x32xf32, #tpu.memory_space<vmem>>, vector<1x2x32xf32>
    %399 = vector.shape_cast %398 : vector<1x2x32xf32> to vector<2x32xf32>
    %400 = vector.shape_cast %397 : vector<2x32xf32> to vector<1x2x32xf32>
    tpu.vector_store %arg7[%c7_89, %c0_90, %c0_91], %400 {strides = array<i32>} : memref<8x2x32xf32, #tpu.memory_space<vmem>>, vector<1x2x32xf32>,
    %c0_92 = arith.constant 0 : index
    %c0_93 = arith.constant 0 : index
    %401 = vector.load %arg8[%c0_92, %c0_93] : memref<2x32xf32, #tpu.memory_space<vmem>>, vector<2x32xf32>
    tpu.vector_store %arg8[%c0_92, %c0_93], %395 {strides = array<i32>} : memref<2x32xf32, #tpu.memory_space<vmem>>, vector<2x32xf32>,
    return
  }
  func.func @transform_0(%arg0: i32) -> (i32, i32, i32) {
    %c0_i32 = arith.constant 0 : i32
    %c0_i32_0 = arith.constant 0 : i32
    %c0_i32_1 = arith.constant 0 : i32
    return %arg0, %c0_i32, %c0_i32_0 : i32, i32, i32
  }
  func.func @transform_1(%arg0: i32) -> (i32, i32) {
    %c0_i32 = arith.constant 0 : i32
    %c0_i32_0 = arith.constant 0 : i32
    %c0_i32_1 = arith.constant 0 : i32
    return %c0_i32, %c0_i32_0 : i32, i32
  }
  func.func @transform_2(%arg0: i32) -> (i32, i32) {
    %c0_i32 = arith.constant 0 : i32
    %c0_i32_0 = arith.constant 0 : i32
    %c0_i32_1 = arith.constant 0 : i32
    return %c0_i32, %c0_i32_0 : i32, i32
  }
  func.func @transform_3(%arg0: i32) -> (i32, i32) {
    %c0_i32 = arith.constant 0 : i32
    %c0_i32_0 = arith.constant 0 : i32
    %c0_i32_1 = arith.constant 0 : i32
    return %c0_i32, %c0_i32_0 : i32, i32
  }
  func.func @transform_4(%arg0: i32) -> (i32, i32) {
    %c0_i32 = arith.constant 0 : i32
    %c0_i32_0 = arith.constant 0 : i32
    %c0_i32_1 = arith.constant 0 : i32
    return %c0_i32, %c0_i32_0 : i32, i32
  }
  func.func @transform_5(%arg0: i32) -> (i32, i32) {
    %c0_i32 = arith.constant 0 : i32
    %c0_i32_0 = arith.constant 0 : i32
    %c0_i32_1 = arith.constant 0 : i32
    return %c0_i32, %c0_i32_0 : i32, i32
  }
  func.func @transform_6(%arg0: i32) -> (i32, i32, i32) {
    %c0_i32 = arith.constant 0 : i32
    %c0_i32_0 = arith.constant 0 : i32
    %c0_i32_1 = arith.constant 0 : i32
    return %arg0, %c0_i32, %c0_i32_0 : i32, i32, i32
  }
}

</mosaic_0001>

<bundles_post_ra>
// kernel: encoder_forward.1
= control target key start
LH: loop header
LB: loop body
LE: loop exit
PB: predicated region body
PF: predicated region fallthrough
CT: control target
= control target key end

     0   :  { %vm28_vm0 = vcmask 254976   ;;  %v1546_v0 = vmov 0.0   ;;  %vm1547_vm1 = vmmov 0   ;;  %vm67_vm2 = vcmask 261120   ;;  %s1548_s7 = smov 64   ;;  %s1550_s10 = smov 32   ;;  %s1887_s2 = inlined_call_operand.vmem [shape: bf16[32,96], index: 2, kind: input, shape index: {}]   ;;  %s1888_s3 = inlined_call_operand.vmem [shape: bf16[32,96], index: 3, kind: input, shape index: {}]   ;;  %s1889_s0 = inlined_call_operand.vmem [shape: bf16[8,2,32], index: 0, kind: input, shape index: {}]   ;;  %s1890_s5 = inlined_call_operand.vmem [shape: f32[1,96], index: 5, kind: input, shape index: {}]   ;;  %s1891_s4 = inlined_call_operand.vmem [shape: f32[1,96], index: 4, kind: input, shape index: {}]   ;;  %s1892_s1 = inlined_call_operand.vmem [shape: f32[2,1], index: 1, kind: input, shape index: {}]   ;;  %s1893_s6 = inlined_call_operand.vmem [shape: f32[8,2,32], index: 6, kind: output, shape index: {}]  }
   0x1   :  { %1359 = vmatprep.subr.bf16.mxu0 %v1546_v0  ;;  %1367 = vmatprep.subr.bf16.mxu1 %v1546_v0  ;;  %v1591_v1 = vld [vmem:[%s1887_s2] sm:$0xff]   ;;  %29 = vst.msk [vmem:[#allocation2] sm:$0x3] %vm28_vm0, %v1546_v0  ;;  %v1608_v3 = vld [vmem:[%s1887_s2 + $0x8] sm:$0xff]   ;;  %v1549_v29 = vmov 0  }
   0x2   :  { %v1598_v2 = vld [vmem:[%s1888_s3] sm:$0xff]   ;;  %1363 = vmatprep.mubr.msk.bf16.mxu0 %vm1547_vm1, %v1546_v0  ;;  %1371 = vmatprep.mubr.msk.bf16.mxu1 %vm1547_vm1, %v1546_v0  ;;  %v1615_v4 = vld [vmem:[%s1888_s3 + $0x8] sm:$0xff]  }
   0x3   :  { %1360 = vmatpush3.bf16.msra.mxu0 %v1591_v1  ;;  %1368 = vmatpush3.bf16.msra.mxu1 %v1598_v2  ;;  %v48_v5 = vld [vmem:[%s1889_s0] sm:$0x1]  ;;  %v1270_v37 = vld [vmem:[%s1889_s0 + $0x1] sm:$0x1] }
   0x4   :  { %1361 = vmatprep.subr.bf16.mxu0 %v1546_v0  ;;  %1369 = vmatprep.subr.bf16.mxu1 %v1546_v0  ;;  %v1646_v8 = vld [vmem:[%s1890_s5] ss:$0 sm:$0xff] }
   0x5   :  { %v1653_v18 = vld [vmem:[%s1891_s4] ss:$0 sm:$0xff]  ;;  %1492 = vset.pattern.permute.xlu0 %v1549_v29  ;;  %1493 = vset.pattern.permute.xlu1 %v1549_v29 }
   0x6   :  { %v1660_v30 = vld [vmem:[%s1892_s1] sm:$0x3] }
   0x7   :  { %1362 = vmatpush3.bf16.msra.mxu0 %v1608_v3  ;;  %1370 = vmatpush3.bf16.msra.mxu1 %v1615_v4  ;;  %vm45_vm3 = vcmp.gt.f32.partialorder %v1660_v30, 0.0  ;;  %vm228_vm4 = vcmp.gt.f32.partialorder %v1660_v30, 1.0  ;;  %vm375_vm5 = vcmp.gt.f32.partialorder %v1660_v30, 2.0  ;;  %vm522_vm6 = vcmp.gt.f32.partialorder %v1660_v30, 3.0 }
   0x8   :  { %v1623_v6 = vld [vmem:[#allocation2] sm:$0x3]  ;;  %1375 = vmatprep.subr.bf16.mxu0 %v1546_v0  ;;  %1383 = vmatprep.subr.bf16.mxu1 %v1546_v0  ;;  %v1259_v31 = vsel %vm45_vm3, 1.0, %v1546_v0  ;;  %vm669_vm7 = vcmp.gt.f32.partialorder %v1660_v30, 4.0  ;;  %vm816_vm8 = vcmp.gt.f32.partialorder %v1660_v30, 5.0  ;;  %vm963_vm9 = vcmp.gt.f32.partialorder %v1660_v30, 6.0 }
   0x9   :  { %v111_v7 = vpack.c.bf16 %v1623_v6, %v1623_v6  ;;  %vm1110_vm10 = vcmp.gt.f32.partialorder %v1660_v30, 7.0 }
   0xa   :  { %1364 = vmatmul.mubr.msk.bf16.vlgmr.msra.gmra.mrb[0].mxu0 %vm67_vm2, %v48_v5 }
   0xb   :  { %1372 = vmatmul.mubr.msk.bf16.vlgmr.msra.gmra.mrb[0].mxu1 %vm67_vm2, %v111_v7  ;;  %1376 = vmatpush3.bf16.msra.mxu0 %v1591_v1 }
   0xc   :  { %1384 = vmatpush3.bf16.msra.mxu1 %v1598_v2  ;;  %1377 = vmatprep.subr.bf16.mxu0 %v1546_v0 }
   0xd   :  { %1385 = vmatprep.subr.bf16.mxu1 %v1546_v0  ;;  %1379 = vmatprep.mubr.msk.bf16.mxu0 %vm1547_vm1, %v1546_v0 }
   0xe   :  { %1387 = vmatprep.mubr.msk.bf16.mxu1 %vm1547_vm1, %v1546_v0 }
   0xf   :  { %1378 = vmatpush3.bf16.msra.mxu0 %v1608_v3 }
  0x10   :  { %1386 = vmatpush3.bf16.msra.mxu1 %v1615_v4  ;;  %1391 = vmatprep.subr.bf16.mxu0 %v1546_v0 }
  0x11   :  { %1399 = vmatprep.subr.bf16.mxu1 %v1546_v0 }
  0x12   :  { %1380 = vmatmul.mubr.msk.bf16.vlgmr.msra.gmra.mrb[4].mxu0 %vm67_vm2, %v1270_v37 }
  0x13   :  { %1392 = vmatpush3.bf16.msra.mxu0 %v1591_v1  ;;  %1395 = vmatprep.mubr.msk.bf16.mxu0 %vm1547_vm1, %v1546_v0 }
  0x14   :  { %1393 = vmatprep.subr.bf16.mxu0 %v1546_v0 }
  0x17   :  { %1394 = vmatpush3.bf16.msra.mxu0 %v1608_v3 }
  0x18   :  { %1407 = vmatprep.subr.bf16.mxu0 %v1546_v0 }
  0xdd   :  { %v105_v9 = vpop.f32.mrb[0].mxu0 }
  0xde   :  { %v167_v10 = vpop.f32.mrb[0].mxu1  ;;  %v1365_v11 = vpop.f32.mrb[1].mxu0  ;;  %v106_v19 = vadd.f32 %v1653_v18, %v105_v9 }
  0xdf   :  { %v168_v12 = vadd.f32 %v1646_v8, %v167_v10  ;;  %v1373_v13 = vpop.f32.mrb[1].mxu1  ;;  %v108_v14 = vpop.f32.mrb[2].mxu0  ;;  %v1269_v10 = vsel %vm228_vm4, 1.0, %v1546_v0 }
  0xe0   :  { %v170_v15 = vpop.f32.mrb[2].mxu1  ;;  %v1366_v16 = vpop.f32.mrb[3].mxu0 }
  0xe1   :  { %181 = vrot.lane.b32.xlu0 %v168_v12, %s1548_s7  ;;  %v1374_v17 = vpop.f32.mrb[3].mxu1  ;;  %v173_v20 = vadd.f32 %v168_v12, %v106_v19  ;;  %v1276_v16 = vld [vmem:[%s1889_s0 + $0x2] sm:$0x1] }
  0xe2   :  { %1396 = vmatmul.mubr.msk.bf16.vlgmr.msra.gmra.mrb[8].mxu0 %vm67_vm2, %v1276_v16 }
  0xe3   :  { %v1268_v21 = vmul.f32 -1.442695, %v173_v20  ;;  %1408 = vmatpush3.bf16.msra.mxu0 %v1591_v1  ;;  %1411 = vmatprep.mubr.msk.bf16.mxu0 %vm1547_vm1, %v1546_v0 }
  0xe4   :  { %1409 = vmatprep.subr.bf16.mxu0 %v1546_v0 }
  0xe5   :  { %1498 = vpow2.f32 %v1268_v21  ;;  %v270_v48 = vpop.f32.mrb[4].mxu0 }
  0xe6   :  { %v1381_v49 = vpop.f32.mrb[5].mxu0  ;;  %v271_v57 = vadd.f32 %v1653_v18, %v270_v48  ;;  %v1275_v48 = vsel %vm375_vm5, 1.0, %v1546_v0 }
  0xe7   :  { %v273_v50 = vpop.f32.mrb[6].mxu0  ;;  %1410 = vmatpush3.bf16.msra.mxu0 %v1608_v3 }
  0xe8   :  { %v1382_v51 = vpop.f32.mrb[7].mxu0  ;;  %1423 = vmatprep.subr.bf16.mxu0 %v1546_v0 }
  0xef   :  { %v1499_v22 = vpop.eup %1498 }
  0xf0   :  { %v177_v23 = vadd.f32 1.0, %v1499_v22 }
  0xf2   :  { %1500 = vrcp.f32 %v177_v23 }
  0xfc   :  { %v1501_v24 = vpop.eup %1500 }
 0x153   :  { %v182_v25 = vpop.permute.xlu0 %181 }
 0x154   :  { %v184_v26 = vmul.f32 %v1501_v24, %v182_v25 }
 0x156   :  { %186 = vrot.lane.b32.xlu0 %v184_v26, %s1548_s7 }
 0x15a   :  { %213 = vperm.xlu0 %1492, %v1259_v31  }
 0x1c8   :  { %v187_v27 = vpop.permute.xlu0 %186 }
 0x1c9   :  { %v189_v28 = vadd.f32 %v187_v27, %v106_v19  ;;  %v417_v27 = vpop.f32.mrb[8].mxu0 }
 0x1ca   :  { %v418_v37 = vadd.f32 %v1653_v18, %v417_v27  ;;  %v1281_v27 = vsel %vm522_vm6, 1.0, %v1546_v0 }
 0x1cb   :  { %1502 = vtanh.f32 %v189_v28  ;;  %v1397_v28 = vpop.f32.mrb[9].mxu0 }
 0x1cc   :  { %v420_v29 = vpop.f32.mrb[10].mxu0 }
 0x1cd   :  { %v1398_v31 = vpop.f32.mrb[11].mxu0 }
 0x1d5   :  { %v1503_v32 = vpop.eup %1502 }
 0x1d6   :  { %192 = vrot.lane.b32.xlu1 %v1503_v32, %s1548_s7 }
 0x1d9   :  { %v214_v41 = vpop.permute.xlu0 %213 }
 0x248   :  { %v193_v33 = vpop.permute.xlu1 %192 }
 0x249   :  { %v195_v34 = vsub.f32 %v1623_v6, %v193_v33 }
 0x24b   :  { %197 = vrot.lane.b32.xlu1 %v195_v34, %s1550_s10 }
 0x2bd   :  { %v198_v35 = vpop.permute.xlu1 %197 }
 0x2be   :  { %v200_v36 = vmul.f32 %v1501_v24, %v198_v35 }
 0x2c0   :  { %202 = vrot.lane.b32.xlu1 %v200_v36, %s1550_s10 }
 0x2c4   :  { %207 = vrot.lane.b32.xlu1 %v1623_v6, %s1548_s7 }
 0x332   :  { %v203_v38 = vpop.permute.xlu1 %202 }
 0x333   :  { %v205_v39 = vadd.f32 %v1503_v32, %v203_v38 }
 0x336   :  { %v208_v40 = vpop.permute.xlu1 %207 }
 0x337   :  { %v210_v42 = vsub.f32 %v205_v39, %v208_v40 }
 0x339   :  { %v216_v43 = vmul.f32 %v214_v41, %v210_v42 }
 0x33b   :  { %218 = vrot.lane.b32.xlu0 %v216_v43, %s1548_s7 }
 0x3ad   :  { %v219_v44 = vpop.permute.xlu0 %218 }
 0x3ae   :  { %v221_v45 = vadd.f32 %v219_v44, %v1623_v6 }
 0x3b0   :  { %v222_v46 = vmul.f32 %v221_v45, %v214_v41  ;;  %v276_v47 = vpack.c.bf16 %v221_v45, %v221_v45 }
 0x3b2   :  { %224 = vst.msk [vmem:[%s1893_s6] sm:$0x3] %vm28_vm0, %v222_v46  ;;  %1388 = vmatmul.mubr.msk.bf16.vlgmr.msra.gmra.mrb[4].mxu1 %vm67_vm2, %v276_v47 }
 0x3b3   :  { %1400 = vmatpush3.bf16.msra.mxu1 %v1598_v2  ;;  %1403 = vmatprep.mubr.msk.bf16.mxu1 %vm1547_vm1, %v1546_v0 }
 0x3b4   :  { %1401 = vmatprep.subr.bf16.mxu1 %v1546_v0 }
 0x3b7   :  { %1402 = vmatpush3.bf16.msra.mxu1 %v1615_v4 }
 0x3b8   :  { %1415 = vmatprep.subr.bf16.mxu1 %v1546_v0 }
 0x485   :  { %v314_v52 = vpop.f32.mrb[4].mxu1 }
 0x486   :  { %v315_v53 = vadd.f32 %v1646_v8, %v314_v52  ;;  %v1389_v54 = vpop.f32.mrb[5].mxu1 }
 0x487   :  { %v317_v55 = vpop.f32.mrb[6].mxu1  ;;  %v1282_v54 = vld [vmem:[%s1889_s0 + $0x3] sm:$0x1] }
 0x488   :  { %328 = vrot.lane.b32.xlu1 %v315_v53, %s1548_s7  ;;  %v1390_v56 = vpop.f32.mrb[7].mxu1  ;;  %v320_v58 = vadd.f32 %v315_v53, %v271_v57  ;;  %1412 = vmatmul.mubr.msk.bf16.vlgmr.msra.gmra.mrb[12].mxu0 %vm67_vm2, %v1282_v54 }
 0x489   :  { %1424 = vmatpush3.bf16.msra.mxu0 %v1591_v1  ;;  %1427 = vmatprep.mubr.msk.bf16.mxu0 %vm1547_vm1, %v1546_v0 }
 0x48a   :  { %v1273_v59 = vmul.f32 -1.442695, %v320_v58  ;;  %1425 = vmatprep.subr.bf16.mxu0 %v1546_v0 }
 0x48c   :  { %1504 = vpow2.f32 %v1273_v59 }
 0x48d   :  { %1426 = vmatpush3.bf16.msra.mxu0 %v1608_v3 }
 0x48e   :  { %1439 = vmatprep.subr.bf16.mxu0 %v1546_v0 }
 0x496   :  { %v1505_v60 = vpop.eup %1504 }
 0x497   :  { %v324_v61 = vadd.f32 1.0, %v1505_v60 }
 0x499   :  { %1506 = vrcp.f32 %v324_v61 }
 0x4a3   :  { %v1507_v62 = vpop.eup %1506 }
 0x4fa   :  { %v329_v63 = vpop.permute.xlu1 %328 }
 0x4fb   :  { %v331_v5 = vmul.f32 %v1507_v62, %v329_v63 }
 0x4fd   :  { %333 = vrot.lane.b32.xlu0 %v331_v5, %s1548_s7 }
 0x55b   :  { %v564_v5 = vpop.f32.mrb[12].mxu0 }
 0x56f   :  { %v334_v6 = vpop.permute.xlu0 %333 }
 0x570   :  { %v336_v7 = vadd.f32 %v334_v6, %v271_v57  ;;  %v1413_v6 = vpop.f32.mrb[13].mxu0 }
 0x572   :  { %1508 = vtanh.f32 %v336_v7  ;;  %v567_v7 = vpop.f32.mrb[14].mxu0 }
 0x57c   :  { %v1509_v9 = vpop.eup %1508 }
 0x57d   :  { %339 = vrot.lane.b32.xlu1 %v1509_v9, %s1548_s7 }
 0x581   :  { %360 = vperm.xlu1 %1493, %v1269_v10  }
 0x585   :  { %354 = vrot.lane.b32.xlu1 %v221_v45, %s1548_s7 }
 0x5ef   :  { %v340_v11 = vpop.permute.xlu1 %339 }
 0x5f0   :  { %v342_v12 = vsub.f32 %v221_v45, %v340_v11 }
 0x5f2   :  { %344 = vrot.lane.b32.xlu0 %v342_v12, %s1550_s10 }
 0x600   :  { %v361_v15 = vpop.permute.xlu1 %360 }
 0x604   :  { %v355_v20 = vpop.permute.xlu1 %354 }
 0x664   :  { %v345_v13 = vpop.permute.xlu0 %344 }
 0x665   :  { %v347_v14 = vmul.f32 %v1507_v62, %v345_v13 }
 0x667   :  { %349 = vrot.lane.b32.xlu0 %v347_v14, %s1550_s10 }
 0x6d9   :  { %v350_v17 = vpop.permute.xlu0 %349 }
 0x6da   :  { %v352_v19 = vadd.f32 %v1509_v9, %v350_v17  ;;  %v1414_v9 = vpop.f32.mrb[15].mxu0 }
 0x6dc   :  { %v357_v21 = vsub.f32 %v352_v19, %v355_v20 }
 0x6de   :  { %v363_v22 = vmul.f32 %v361_v15, %v357_v21 }
 0x6e0   :  { %365 = vrot.lane.b32.xlu0 %v363_v22, %s1548_s7 }
 0x752   :  { %v366_v23 = vpop.permute.xlu0 %365 }
 0x753   :  { %v368_v24 = vadd.f32 %v366_v23, %v221_v45 }
 0x755   :  { %v369_v25 = vmul.f32 %v368_v24, %v361_v15  ;;  %v423_v26 = vpack.c.bf16 %v368_v24, %v368_v24  ;;  %v565_v15 = vadd.f32 %v1653_v18, %v564_v5  ;;  %v1287_v5 = vsel %vm669_vm7, 1.0, %v1546_v0 }
 0x757   :  { %1274 = vst.msk [vmem:[%s1893_s6 + $0x2] sm:$0x3] %vm28_vm0, %v369_v25  ;;  %1404 = vmatmul.mubr.msk.bf16.vlgmr.msra.gmra.mrb[8].mxu1 %vm67_vm2, %v423_v26 }
 0x758   :  { %1416 = vmatpush3.bf16.msra.mxu1 %v1598_v2  ;;  %1419 = vmatprep.mubr.msk.bf16.mxu1 %vm1547_vm1, %v1546_v0 }
 0x759   :  { %1417 = vmatprep.subr.bf16.mxu1 %v1546_v0 }
 0x75c   :  { %1418 = vmatpush3.bf16.msra.mxu1 %v1615_v4 }
 0x75d   :  { %1431 = vmatprep.subr.bf16.mxu1 %v1546_v0 }
 0x82a   :  { %v461_v32 = vpop.f32.mrb[8].mxu1 }
 0x82b   :  { %v462_v33 = vadd.f32 %v1646_v8, %v461_v32  ;;  %v1405_v34 = vpop.f32.mrb[9].mxu1 }
 0x82c   :  { %v464_v35 = vpop.f32.mrb[10].mxu1  ;;  %v1288_v34 = vld [vmem:[%s1889_s0 + $0x4] sm:$0x1] }
 0x82d   :  { %475 = vrot.lane.b32.xlu1 %v462_v33, %s1548_s7  ;;  %v1406_v36 = vpop.f32.mrb[11].mxu1  ;;  %v467_v38 = vadd.f32 %v462_v33, %v418_v37  ;;  %1428 = vmatmul.mubr.msk.bf16.vlgmr.msra.gmra.mrb[16].mxu0 %vm67_vm2, %v1288_v34 }
 0x82e   :  { %1440 = vmatpush3.bf16.msra.mxu0 %v1591_v1  ;;  %1443 = vmatprep.mubr.msk.bf16.mxu0 %vm1547_vm1, %v1546_v0 }
 0x82f   :  { %v1279_v39 = vmul.f32 -1.442695, %v467_v38  ;;  %1441 = vmatprep.subr.bf16.mxu0 %v1546_v0 }
 0x831   :  { %1510 = vpow2.f32 %v1279_v39 }
 0x832   :  { %1442 = vmatpush3.bf16.msra.mxu0 %v1608_v3 }
 0x833   :  { %1455 = vmatprep.subr.bf16.mxu0 %v1546_v0 }
 0x83b   :  { %v1511_v40 = vpop.eup %1510 }
 0x83c   :  { %v471_v41 = vadd.f32 1.0, %v1511_v40 }
 0x83e   :  { %1512 = vrcp.f32 %v471_v41 }
 0x848   :  { %v1513_v42 = vpop.eup %1512 }
 0x89f   :  { %v476_v43 = vpop.permute.xlu1 %475 }
 0x8a0   :  { %v478_v44 = vmul.f32 %v1513_v42, %v476_v43 }
 0x8a2   :  { %480 = vrot.lane.b32.xlu0 %v478_v44, %s1548_s7 }
 0x900   :  { %v711_v44 = vpop.f32.mrb[16].mxu0 }
 0x914   :  { %v481_v45 = vpop.permute.xlu0 %480 }
 0x915   :  { %v483_v46 = vadd.f32 %v481_v45, %v418_v37  ;;  %v1429_v45 = vpop.f32.mrb[17].mxu0 }
 0x917   :  { %1514 = vtanh.f32 %v483_v46  ;;  %v714_v46 = vpop.f32.mrb[18].mxu0 }
 0x921   :  { %v1515_v47 = vpop.eup %1514 }
 0x922   :  { %486 = vrot.lane.b32.xlu1 %v1515_v47, %s1548_s7 }
 0x926   :  { %507 = vperm.xlu1 %1493, %v1275_v48  }
 0x92a   :  { %501 = vrot.lane.b32.xlu1 %v368_v24, %s1548_s7 }
 0x994   :  { %v487_v49 = vpop.permute.xlu1 %486 }
 0x995   :  { %v489_v50 = vsub.f32 %v368_v24, %v487_v49 }
 0x997   :  { %491 = vrot.lane.b32.xlu0 %v489_v50, %s1550_s10 }
 0x9a5   :  { %v508_v53 = vpop.permute.xlu1 %507 }
 0x9a9   :  { %v502_v57 = vpop.permute.xlu1 %501 }
 0xa09   :  { %v492_v51 = vpop.permute.xlu0 %491 }
 0xa0a   :  { %v494_v52 = vmul.f32 %v1513_v42, %v492_v51 }
 0xa0c   :  { %496 = vrot.lane.b32.xlu0 %v494_v52, %s1550_s10 }
 0xa7e   :  { %v497_v55 = vpop.permute.xlu0 %496 }
 0xa7f   :  { %v499_v56 = vadd.f32 %v1515_v47, %v497_v55  ;;  %v1430_v47 = vpop.f32.mrb[19].mxu0 }
 0xa81   :  { %v504_v58 = vsub.f32 %v499_v56, %v502_v57 }
 0xa83   :  { %v510_v59 = vmul.f32 %v508_v53, %v504_v58 }
 0xa85   :  { %512 = vrot.lane.b32.xlu0 %v510_v59, %s1548_s7 }
 0xaf7   :  { %v513_v60 = vpop.permute.xlu0 %512 }
 0xaf8   :  { %v515_v61 = vadd.f32 %v513_v60, %v368_v24 }
 0xafa   :  { %v516_v62 = vmul.f32 %v515_v61, %v508_v53  ;;  %v570_v63 = vpack.c.bf16 %v515_v61, %v515_v61  ;;  %v712_v53 = vadd.f32 %v1653_v18, %v711_v44  ;;  %v1293_v44 = vsel %vm816_vm8, 1.0, %v1546_v0 }
 0xafc   :  { %1280 = vst.msk [vmem:[%s1893_s6 + $0x4] sm:$0x3] %vm28_vm0, %v516_v62  ;;  %1420 = vmatmul.mubr.msk.bf16.vlgmr.msra.gmra.mrb[12].mxu1 %vm67_vm2, %v570_v63 }
 0xafd   :  { %1432 = vmatpush3.bf16.msra.mxu1 %v1598_v2  ;;  %1435 = vmatprep.mubr.msk.bf16.mxu1 %vm1547_vm1, %v1546_v0 }
 0xafe   :  { %1433 = vmatprep.subr.bf16.mxu1 %v1546_v0 }
 0xb01   :  { %1434 = vmatpush3.bf16.msra.mxu1 %v1615_v4 }
 0xb02   :  { %1447 = vmatprep.subr.bf16.mxu1 %v1546_v0 }
 0xbcf   :  { %v608_v10 = vpop.f32.mrb[12].mxu1 }
 0xbd0   :  { %v609_v11 = vadd.f32 %v1646_v8, %v608_v10  ;;  %v1421_v12 = vpop.f32.mrb[13].mxu1 }
 0xbd1   :  { %v611_v13 = vpop.f32.mrb[14].mxu1  ;;  %v1294_v12 = vld [vmem:[%s1889_s0 + $0x5] sm:$0x1] }
 0xbd2   :  { %622 = vrot.lane.b32.xlu1 %v609_v11, %s1548_s7  ;;  %v1422_v14 = vpop.f32.mrb[15].mxu1  ;;  %v614_v16 = vadd.f32 %v609_v11, %v565_v15  ;;  %1444 = vmatmul.mubr.msk.bf16.vlgmr.msra.gmra.mrb[20].mxu0 %vm67_vm2, %v1294_v12 }
 0xbd3   :  { %1456 = vmatpush3.bf16.msra.mxu0 %v1591_v1  ;;  %1459 = vmatprep.mubr.msk.bf16.mxu0 %vm1547_vm1, %v1546_v0 }
 0xbd4   :  { %v1285_v17 = vmul.f32 -1.442695, %v614_v16  ;;  %1457 = vmatprep.subr.bf16.mxu0 %v1546_v0 }
 0xbd6   :  { %1516 = vpow2.f32 %v1285_v17 }
 0xbd7   :  { %1458 = vmatpush3.bf16.msra.mxu0 %v1608_v3 }
 0xbd8   :  { %1471 = vmatprep.subr.bf16.mxu0 %v1546_v0 }
 0xbe0   :  { %v1517_v19 = vpop.eup %1516 }
 0xbe1   :  { %v618_v20 = vadd.f32 1.0, %v1517_v19 }
 0xbe3   :  { %1518 = vrcp.f32 %v618_v20 }
 0xbed   :  { %v1519_v21 = vpop.eup %1518 }
 0xc44   :  { %v623_v22 = vpop.permute.xlu1 %622 }
 0xc45   :  { %v625_v23 = vmul.f32 %v1519_v21, %v623_v22 }
 0xc47   :  { %627 = vrot.lane.b32.xlu0 %v625_v23, %s1548_s7 }
 0xca5   :  { %v858_v23 = vpop.f32.mrb[20].mxu0 }
 0xcb9   :  { %v628_v24 = vpop.permute.xlu0 %627 }
 0xcba   :  { %v630_v25 = vadd.f32 %v628_v24, %v565_v15  ;;  %v1445_v24 = vpop.f32.mrb[21].mxu0 }
 0xcbc   :  { %1520 = vtanh.f32 %v630_v25  ;;  %v861_v25 = vpop.f32.mrb[22].mxu0 }
 0xcbd   :  { %v1306_v25 = vld [vmem:[%s1889_s0 + $0x7] sm:$0x1] }
 0xcc6   :  { %v1521_v26 = vpop.eup %1520 }
 0xcc7   :  { %633 = vrot.lane.b32.xlu1 %v1521_v26, %s1548_s7 }
 0xccb   :  { %654 = vperm.xlu1 %1493, %v1281_v27  }
 0xccf   :  { %648 = vrot.lane.b32.xlu1 %v515_v61, %s1548_s7 }
 0xd39   :  { %v634_v28 = vpop.permute.xlu1 %633 }
 0xd3a   :  { %v636_v29 = vsub.f32 %v515_v61, %v634_v28 }
 0xd3c   :  { %638 = vrot.lane.b32.xlu0 %v636_v29, %s1550_s10 }
 0xd4a   :  { %v655_v33 = vpop.permute.xlu1 %654 }
 0xd4e   :  { %v649_v37 = vpop.permute.xlu1 %648 }
 0xdae   :  { %v639_v31 = vpop.permute.xlu0 %638 }
 0xdaf   :  { %v641_v32 = vmul.f32 %v1519_v21, %v639_v31 }
 0xdb1   :  { %643 = vrot.lane.b32.xlu0 %v641_v32, %s1550_s10 }
 0xe23   :  { %v644_v35 = vpop.permute.xlu0 %643 }
 0xe24   :  { %v646_v36 = vadd.f32 %v1521_v26, %v644_v35  ;;  %v1446_v26 = vpop.f32.mrb[23].mxu0 }
 0xe26   :  { %v651_v38 = vsub.f32 %v646_v36, %v649_v37 }
 0xe28   :  { %v657_v39 = vmul.f32 %v655_v33, %v651_v38 }
 0xe2a   :  { %659 = vrot.lane.b32.xlu0 %v657_v39, %s1548_s7 }
 0xe9c   :  { %v660_v40 = vpop.permute.xlu0 %659 }
 0xe9d   :  { %v662_v41 = vadd.f32 %v660_v40, %v515_v61 }
 0xe9f   :  { %v663_v42 = vmul.f32 %v662_v41, %v655_v33  ;;  %v717_v43 = vpack.c.bf16 %v662_v41, %v662_v41  ;;  %v859_v33 = vadd.f32 %v1653_v18, %v858_v23 }
 0xea1   :  { %1286 = vst.msk [vmem:[%s1893_s6 + $0x6] sm:$0x3] %vm28_vm0, %v663_v42  ;;  %1436 = vmatmul.mubr.msk.bf16.vlgmr.msra.gmra.mrb[16].mxu1 %vm67_vm2, %v717_v43 }
 0xea2   :  { %1448 = vmatpush3.bf16.msra.mxu1 %v1598_v2  ;;  %1451 = vmatprep.mubr.msk.bf16.mxu1 %vm1547_vm1, %v1546_v0 }
 0xea3   :  { %1449 = vmatprep.subr.bf16.mxu1 %v1546_v0 }
 0xea6   :  { %1450 = vmatpush3.bf16.msra.mxu1 %v1615_v4 }
 0xea7   :  { %1463 = vmatprep.subr.bf16.mxu1 %v1546_v0 }
 0xf74   :  { %v755_v48 = vpop.f32.mrb[16].mxu1 }
 0xf75   :  { %v756_v49 = vadd.f32 %v1646_v8, %v755_v48  ;;  %v1437_v50 = vpop.f32.mrb[17].mxu1 }
 0xf76   :  { %v758_v51 = vpop.f32.mrb[18].mxu1  ;;  %v1300_v50 = vld [vmem:[%s1889_s0 + $0x6] sm:$0x1] }
 0xf77   :  { %769 = vrot.lane.b32.xlu1 %v756_v49, %s1548_s7  ;;  %v1438_v52 = vpop.f32.mrb[19].mxu1  ;;  %v761_v54 = vadd.f32 %v756_v49, %v712_v53  ;;  %1460 = vmatmul.mubr.msk.bf16.vlgmr.msra.gmra.mrb[24].mxu0 %vm67_vm2, %v1300_v50 }
 0xf78   :  { %1472 = vmatpush3.bf16.msra.mxu0 %v1591_v1  ;;  %1475 = vmatprep.mubr.msk.bf16.mxu0 %vm1547_vm1, %v1546_v0 }
 0xf79   :  { %v1291_v55 = vmul.f32 -1.442695, %v761_v54  ;;  %1473 = vmatprep.subr.bf16.mxu0 %v1546_v0 }
 0xf7b   :  { %1522 = vpow2.f32 %v1291_v55 }
 0xf7c   :  { %1474 = vmatpush3.bf16.msra.mxu0 %v1608_v3 }
 0xf7f   :  { %1476 = vmatmul.mubr.msk.bf16.vlgmr.msra.gmra.mrb[28].mxu0 %vm67_vm2, %v1306_v25 }
 0xf85   :  { %v1523_v56 = vpop.eup %1522 }
 0xf86   :  { %v765_v57 = vadd.f32 1.0, %v1523_v56 }
 0xf88   :  { %1524 = vrcp.f32 %v765_v57 }
 0xf92   :  { %v1525_v58 = vpop.eup %1524 }
 0xfe9   :  { %v770_v59 = vpop.permute.xlu1 %769 }
 0xfea   :  { %v772_v60 = vmul.f32 %v1525_v58, %v770_v59 }
 0xfec   :  { %774 = vrot.lane.b32.xlu0 %v772_v60, %s1548_s7 }
0x104a   :  { %v1005_v1 = vpop.f32.mrb[24].mxu0 }
0x104b   :  { %v1461_v3 = vpop.f32.mrb[25].mxu0 }
0x104c   :  { %v1008_v60 = vpop.f32.mrb[26].mxu0 }
0x105e   :  { %v775_v61 = vpop.permute.xlu0 %774 }
0x105f   :  { %v777_v62 = vadd.f32 %v775_v61, %v712_v53  ;;  %v1462_v61 = vpop.f32.mrb[27].mxu0 }
0x1061   :  { %1526 = vtanh.f32 %v777_v62 }
0x106b   :  { %v1527_v63 = vpop.eup %1526 }
0x106c   :  { %780 = vrot.lane.b32.xlu1 %v1527_v63, %s1548_s7 }
0x1070   :  { %801 = vperm.xlu1 %1493, %v1287_v5  }
0x1074   :  { %795 = vrot.lane.b32.xlu1 %v662_v41, %s1548_s7 }
0x10de   :  { %v781_v6 = vpop.permute.xlu1 %780 }
0x10df   :  { %v783_v7 = vsub.f32 %v662_v41, %v781_v6 }
0x10e1   :  { %785 = vrot.lane.b32.xlu0 %v783_v7, %s1550_s10 }
0x10ef   :  { %v802_v11 = vpop.permute.xlu1 %801 }
0x10f3   :  { %v796_v15 = vpop.permute.xlu1 %795 }
0x1153   :  { %v786_v9 = vpop.permute.xlu0 %785 }
0x1154   :  { %v788_v10 = vmul.f32 %v1525_v58, %v786_v9 }
0x1156   :  { %790 = vrot.lane.b32.xlu0 %v788_v10, %s1550_s10 }
0x11c8   :  { %v791_v13 = vpop.permute.xlu0 %790 }
0x11c9   :  { %v793_v14 = vadd.f32 %v1527_v63, %v791_v13 }
0x11cb   :  { %v798_v16 = vsub.f32 %v793_v14, %v796_v15 }
0x11cd   :  { %v804_v17 = vmul.f32 %v802_v11, %v798_v16 }
0x11cf   :  { %806 = vrot.lane.b32.xlu0 %v804_v17, %s1548_s7 }
0x1241   :  { %v807_v19 = vpop.permute.xlu0 %806 }
0x1242   :  { %v809_v20 = vadd.f32 %v807_v19, %v662_v41  ;;  %v1299_v19 = vsel %vm963_vm9, 1.0, %v1546_v0 }
0x1244   :  { %v810_v21 = vmul.f32 %v809_v20, %v802_v11  ;;  %v864_v22 = vpack.c.bf16 %v809_v20, %v809_v20 }
0x1246   :  { %1292 = vst.msk [vmem:[%s1893_s6 + $0x8] sm:$0x3] %vm28_vm0, %v810_v21  ;;  %1452 = vmatmul.mubr.msk.bf16.vlgmr.msra.gmra.mrb[20].mxu1 %vm67_vm2, %v864_v22 }
0x1247   :  { %1464 = vmatpush3.bf16.msra.mxu1 %v1598_v2  ;;  %1467 = vmatprep.mubr.msk.bf16.mxu1 %vm1547_vm1, %v1546_v0 }
0x1248   :  { %1465 = vmatprep.subr.bf16.mxu1 %v1546_v0 }
0x124b   :  { %1466 = vmatpush3.bf16.msra.mxu1 %v1615_v4 }
0x124c   :  { %1479 = vmatprep.subr.bf16.mxu1 %v1546_v0 }
0x1319   :  { %v902_v27 = vpop.f32.mrb[20].mxu1 }
0x131a   :  { %v903_v28 = vadd.f32 %v1646_v8, %v902_v27  ;;  %v1453_v29 = vpop.f32.mrb[21].mxu1 }
0x131b   :  { %v905_v31 = vpop.f32.mrb[22].mxu1 }
0x131c   :  { %916 = vrot.lane.b32.xlu1 %v903_v28, %s1548_s7  ;;  %v1454_v32 = vpop.f32.mrb[23].mxu1  ;;  %v908_v34 = vadd.f32 %v903_v28, %v859_v33 }
0x131e   :  { %v1297_v35 = vmul.f32 -1.442695, %v908_v34 }
0x1320   :  { %1528 = vpow2.f32 %v1297_v35 }
0x132a   :  { %v1529_v36 = vpop.eup %1528 }
0x132b   :  { %v912_v37 = vadd.f32 1.0, %v1529_v36  ;;  %v1152_v36 = vpop.f32.mrb[28].mxu0 }
0x132d   :  { %1530 = vrcp.f32 %v912_v37  ;;  %v1477_v37 = vpop.f32.mrb[29].mxu0 }
0x1337   :  { %v1531_v38 = vpop.eup %1530 }
0x138e   :  { %v917_v39 = vpop.permute.xlu1 %916 }
0x138f   :  { %v919_v40 = vmul.f32 %v1531_v38, %v917_v39 }
0x1391   :  { %921 = vrot.lane.b32.xlu0 %v919_v40, %s1548_s7 }
0x1403   :  { %v922_v41 = vpop.permute.xlu0 %921 }
0x1404   :  { %v924_v42 = vadd.f32 %v922_v41, %v859_v33 }
0x1406   :  { %1532 = vtanh.f32 %v924_v42 }
0x1410   :  { %v1533_v43 = vpop.eup %1532 }
0x1411   :  { %927 = vrot.lane.b32.xlu1 %v1533_v43, %s1548_s7 }
0x1415   :  { %948 = vperm.xlu1 %1493, %v1293_v44  }
0x1419   :  { %942 = vrot.lane.b32.xlu1 %v809_v20, %s1548_s7 }
0x1483   :  { %v928_v45 = vpop.permute.xlu1 %927 }
0x1484   :  { %v930_v46 = vsub.f32 %v809_v20, %v928_v45  ;;  %v1153_v45 = vadd.f32 %v1653_v18, %v1152_v36 }
0x1486   :  { %932 = vrot.lane.b32.xlu0 %v930_v46, %s1550_s10 }
0x1494   :  { %v949_v49 = vpop.permute.xlu1 %948 }
0x1498   :  { %v943_v53 = vpop.permute.xlu1 %942 }
0x14f8   :  { %v933_v47 = vpop.permute.xlu0 %932 }
0x14f9   :  { %v935_v48 = vmul.f32 %v1531_v38, %v933_v47  ;;  %v1155_v38 = vpop.f32.mrb[30].mxu0 }
0x14fa   :  { %v1478_v39 = vpop.f32.mrb[31].mxu0 }
0x14fb   :  { %937 = vrot.lane.b32.xlu0 %v935_v48, %s1550_s10 }
0x156d   :  { %v938_v51 = vpop.permute.xlu0 %937 }
0x156e   :  { %v940_v52 = vadd.f32 %v1533_v43, %v938_v51 }
0x1570   :  { %v945_v54 = vsub.f32 %v940_v52, %v943_v53 }
0x1572   :  { %v951_v55 = vmul.f32 %v949_v49, %v945_v54 }
0x1574   :  { %953 = vrot.lane.b32.xlu0 %v951_v55, %s1548_s7 }
0x15e6   :  { %v954_v56 = vpop.permute.xlu0 %953 }
0x15e7   :  { %v956_v57 = vadd.f32 %v954_v56, %v809_v20 }
0x15e9   :  { %v957_v58 = vmul.f32 %v956_v57, %v949_v49  ;;  %v1011_v59 = vpack.c.bf16 %v956_v57, %v956_v57 }
0x15eb   :  { %1298 = vst.msk [vmem:[%s1893_s6 + $0xa] sm:$0x3] %vm28_vm0, %v957_v58  ;;  %1468 = vmatmul.mubr.msk.bf16.vlgmr.msra.gmra.mrb[24].mxu1 %vm67_vm2, %v1011_v59 }
0x15ec   :  { %1480 = vmatpush3.bf16.msra.mxu1 %v1598_v2  ;;  %1483 = vmatprep.mubr.msk.bf16.mxu1 %vm1547_vm1, %v1546_v0  ;;  %v1006_v2 = vadd.f32 %v1653_v18, %v1005_v1  ;;  %v1305_v18 = vsel %vm1110_vm10, 1.0, %v1546_v0 }
0x15ed   :  { %1481 = vmatprep.subr.bf16.mxu1 %v1546_v0 }
0x15f0   :  { %1482 = vmatpush3.bf16.msra.mxu1 %v1615_v4 }
0x16be   :  { %v1049_v62 = vpop.f32.mrb[24].mxu1 }
0x16bf   :  { %v1050_v63 = vadd.f32 %v1646_v8, %v1049_v62  ;;  %v1469_v5 = vpop.f32.mrb[25].mxu1 }
0x16c0   :  { %v1052_v6 = vpop.f32.mrb[26].mxu1 }
0x16c1   :  { %1063 = vrot.lane.b32.xlu1 %v1050_v63, %s1548_s7  ;;  %v1470_v7 = vpop.f32.mrb[27].mxu1  ;;  %v1055_v9 = vadd.f32 %v1050_v63, %v1006_v2 }
0x16c3   :  { %v1303_v10 = vmul.f32 -1.442695, %v1055_v9 }
0x16c5   :  { %1534 = vpow2.f32 %v1303_v10 }
0x16cf   :  { %v1535_v11 = vpop.eup %1534 }
0x16d0   :  { %v1059_v12 = vadd.f32 1.0, %v1535_v11 }
0x16d2   :  { %1536 = vrcp.f32 %v1059_v12 }
0x16dc   :  { %v1537_v4 = vpop.eup %1536 }
0x1733   :  { %v1064_v13 = vpop.permute.xlu1 %1063 }
0x1734   :  { %v1066_v14 = vmul.f32 %v1537_v4, %v1064_v13 }
0x1736   :  { %1068 = vrot.lane.b32.xlu0 %v1066_v14, %s1548_s7 }
0x17a8   :  { %v1069_v15 = vpop.permute.xlu0 %1068 }
0x17a9   :  { %v1071_v16 = vadd.f32 %v1069_v15, %v1006_v2 }
0x17ab   :  { %1538 = vtanh.f32 %v1071_v16 }
0x17b5   :  { %v1539_v17 = vpop.eup %1538 }
0x17b6   :  { %1074 = vrot.lane.b32.xlu1 %v1539_v17, %s1548_s7 }
0x17ba   :  { %1095 = vperm.xlu1 %1493, %v1299_v19  }
0x17be   :  { %1089 = vrot.lane.b32.xlu1 %v956_v57, %s1548_s7 }
0x1828   :  { %v1075_v20 = vpop.permute.xlu1 %1074 }
0x1829   :  { %v1077_v21 = vsub.f32 %v956_v57, %v1075_v20 }
0x182b   :  { %1079 = vrot.lane.b32.xlu0 %v1077_v21, %s1550_s10 }
0x1839   :  { %v1096_v24 = vpop.permute.xlu1 %1095 }
0x183d   :  { %v1090_v28 = vpop.permute.xlu1 %1089 }
0x189d   :  { %v1080_v22 = vpop.permute.xlu0 %1079 }
0x189e   :  { %v1082_v23 = vmul.f32 %v1537_v4, %v1080_v22 }
0x18a0   :  { %1084 = vrot.lane.b32.xlu0 %v1082_v23, %s1550_s10 }
0x1912   :  { %v1085_v26 = vpop.permute.xlu0 %1084 }
0x1913   :  { %v1087_v27 = vadd.f32 %v1539_v17, %v1085_v26 }
0x1915   :  { %v1092_v29 = vsub.f32 %v1087_v27, %v1090_v28 }
0x1917   :  { %v1098_v31 = vmul.f32 %v1096_v24, %v1092_v29 }
0x1919   :  { %1100 = vrot.lane.b32.xlu0 %v1098_v31, %s1548_s7 }
0x198b   :  { %v1101_v32 = vpop.permute.xlu0 %1100 }
0x198c   :  { %v1103_v33 = vadd.f32 %v1101_v32, %v956_v57 }
0x198e   :  { %v1104_v34 = vmul.f32 %v1103_v33, %v1096_v24  ;;  %v1158_v35 = vpack.c.bf16 %v1103_v33, %v1103_v33 }
0x1990   :  { %1304 = vst.msk [vmem:[%s1893_s6 + $0xc] sm:$0x3] %vm28_vm0, %v1104_v34  ;;  %1484 = vmatmul.mubr.msk.bf16.vlgmr.msra.gmra.mrb[28].mxu1 %vm67_vm2, %v1158_v35 }
0x1a63   :  { %v1196_v40 = vpop.f32.mrb[28].mxu1 }
0x1a64   :  { %v1197_v41 = vadd.f32 %v1646_v8, %v1196_v40  ;;  %v1485_v42 = vpop.f32.mrb[29].mxu1 }
0x1a65   :  { %v1199_v43 = vpop.f32.mrb[30].mxu1 }
0x1a66   :  { %1210 = vrot.lane.b32.xlu1 %v1197_v41, %s1548_s7  ;;  %v1486_v44 = vpop.f32.mrb[31].mxu1  ;;  %v1202_v46 = vadd.f32 %v1197_v41, %v1153_v45 }
0x1a68   :  { %v1309_v47 = vmul.f32 -1.442695, %v1202_v46 }
0x1a6a   :  { %1540 = vpow2.f32 %v1309_v47 }
0x1a74   :  { %v1541_v48 = vpop.eup %1540 }
0x1a75   :  { %v1206_v49 = vadd.f32 1.0, %v1541_v48 }
0x1a77   :  { %1542 = vrcp.f32 %v1206_v49 }
0x1a81   :  { %v1543_v50 = vpop.eup %1542 }
0x1ad8   :  { %v1211_v51 = vpop.permute.xlu1 %1210 }
0x1ad9   :  { %v1213_v52 = vmul.f32 %v1543_v50, %v1211_v51 }
0x1adb   :  { %1215 = vrot.lane.b32.xlu0 %v1213_v52, %s1548_s7 }
0x1b4d   :  { %v1216_v53 = vpop.permute.xlu0 %1215 }
0x1b4e   :  { %v1218_v8 = vadd.f32 %v1216_v53, %v1153_v45 }
0x1b50   :  { %1544 = vtanh.f32 %v1218_v8 }
0x1b5a   :  { %v1545_v54 = vpop.eup %1544 }
0x1b5b   :  { %1221 = vrot.lane.b32.xlu1 %v1545_v54, %s1548_s7 }
0x1b5f   :  { %1242 = vperm.xlu1 %1493, %v1305_v18  }
0x1b63   :  { %1236 = vrot.lane.b32.xlu1 %v1103_v33, %s1548_s7 }
0x1bcd   :  { %v1222_v55 = vpop.permute.xlu1 %1221 }
0x1bce   :  { %v1224_v56 = vsub.f32 %v1103_v33, %v1222_v55 }
0x1bd0   :  { %1226 = vrot.lane.b32.xlu0 %v1224_v56, %s1550_s10 }
0x1bde   :  { %v1243_v59 = vpop.permute.xlu1 %1242 }
0x1be2   :  { %v1237_v30 = vpop.permute.xlu1 %1236 }
0x1c42   :  { %v1227_v57 = vpop.permute.xlu0 %1226 }
0x1c43   :  { %v1229_v58 = vmul.f32 %v1543_v50, %v1227_v57 }
0x1c45   :  { %1231 = vrot.lane.b32.xlu0 %v1229_v58, %s1550_s10 }
0x1cb7   :  { %v1232_v1 = vpop.permute.xlu0 %1231 }
0x1cb8   :  { %v1234_v3 = vadd.f32 %v1545_v54, %v1232_v1 }
0x1cba   :  { %v1239_v60 = vsub.f32 %v1234_v3, %v1237_v30 }
0x1cbc   :  { %v1245_v61 = vmul.f32 %v1243_v59, %v1239_v60 }
0x1cbe   :  { %1247 = vrot.lane.b32.xlu0 %v1245_v61, %s1548_s7 }
0x1d30   :  { %v1248_v0 = vpop.permute.xlu0 %1247 }
0x1d31   :  { %v1250_v62 = vadd.f32 %v1248_v0, %v1103_v33 }
0x1d33   :  { %v1251_v63 = vmul.f32 %v1250_v62, %v1243_v59  ;;  %1254 = vst.msk [vmem:[#allocation2] sm:$0x3] %vm28_vm0, %v1250_v62 }
0x1d35   :  { %1310 = vst.msk [vmem:[%s1893_s6 + $0xe] sm:$0x3] %vm28_vm0, %v1251_v63 }

</bundles_post_ra>
